<compile_context>
chip_gen: v7x
topology: tpu7x:2x2x1
jax: 0.10.0
libtpu: 0.0.40
codegen_flags: <defaults>
</compile_context>

<pallas_src>
import jax
import jax.numpy as jnp
from jax.experimental import pallas as pl
from jax.experimental.pallas import tpu as pltpu

GLOBAL_HIDDEN = 2      # module-level `hidden_size = 2` hard-wired into fc_1
_LANES = 128
_LAYER_ROWS = 24       # 3 blocks of 8 rows per LSTM layer in the packed slab
_OUT_ROWS = 8          # output rows padded to a full sublane tile


def _make_kernel(num_layers: int, seq_len: int, batch: int, in_size: int, hidden: int):
    """Fused LSTM + MLP head. Gates along sublanes, batch along lanes."""
    H = hidden
    G = 4 * H                     # == 8 (asserted by the wrapper)
    T = seq_len
    B = batch
    LB = num_layers * B
    fc_base = num_layers * _LAYER_ROWS

    def kernel(x_ref, p_ref, out_ref):
        # ---- hoisted constants (JAX does not CSE broadcasts: build once) ----
        ridx = jax.lax.broadcasted_iota(jnp.int32, (G, B), 0)
        is_g_row = (ridx >= 2 * H) & (ridx < 3 * H)        # tanh (g) gate rows
        pre = jnp.where(is_g_row, 1.0, 0.5).astype(jnp.float32)
        shift = jnp.where(is_g_row, 0.0, 0.5).astype(jnp.float32)

        finals = []            # per-layer final hidden state, (H, B)
        prev_hs = None         # per-step hidden states of the previous layer
        for l in range(num_layers):
            base = l * _LAYER_ROWS
            in_dim = in_size if l == 0 else H
            wih_blk = p_ref[base:base + 8, :]        # rows = gates, lanes = inputs
            whh_blk = p_ref[base + 8:base + 16, :]   # rows = gates, lanes = hidden
            b_blk = p_ref[base + 16:base + 24, :]    # column 0 = folded bias (G,)

            # Hoisted lane-broadcasts of weight columns (off the critical path).
            whh_b = [jnp.broadcast_to(whh_blk[:, j:j + 1], (G, B)) for j in range(H)]
            b_col = jnp.broadcast_to(b_blk[:, 0:1], (G, B))

            # ---- hoisted input projection for the whole sequence (VPU only) ----
            if l == 0:
                x_all = x_ref[...]                               # (in_size, T*B)
                wih_b = [jnp.broadcast_to(wih_blk[:, j:j + 1], (G, T * B))
                         for j in range(in_dim)]
                proj_all = jnp.broadcast_to(b_blk[:, 0:1], (G, T * B))
                for j in range(in_dim):
                    proj_all = proj_all + wih_b[j] * x_all[j:j + 1, :]
                proj = [proj_all[:, t * B:(t + 1) * B] for t in range(T)]
            else:
                wih_b = [jnp.broadcast_to(wih_blk[:, j:j + 1], (G, B))
                         for j in range(in_dim)]
                proj = []
                for t in range(T):
                    acc = b_col
                    for j in range(in_dim):
                        acc = acc + wih_b[j] * prev_hs[t][j:j + 1, :]
                    proj.append(acc)

            # ---- recurrence: only h-dependent work per step, 2 EUP pushes ----
            h = jnp.zeros((H, B), jnp.float32)
            c = jnp.zeros((H, B), jnp.float32)
            outs = []
            for t in range(T):
                g_pre = proj[t]
                for j in range(H):                      # h @ w_hh^T, sublane-row FMAs
                    g_pre = g_pre + whh_b[j] * h[j:j + 1, :]
                # all four gates with ONE tanh: sigmoid(z) = 0.5*tanh(z/2) + 0.5
                a = pre * jnp.tanh(pre * g_pre) + shift
                i_g = a[0:H, :]
                f_g = a[H:2 * H, :]
                g_g = a[2 * H:3 * H, :]
                o_g = a[3 * H:4 * H, :]
                c = f_g * c + i_g * g_g
                h = o_g * jnp.tanh(c)
                outs.append(h)
            prev_hs = outs
            finals.append(h)

        # ---- head: relu -> fc1 -> relu -> fc2 (all off the critical path) ----
        # hn^T (H, L*B); columns ordered layer-major, batch-minor == hn.view(-1,H) rows.
        hn_t = jnp.maximum(jnp.concatenate(finals, axis=1), 0.0)

        # Tiny (1, L*B) lane-rows -> (OUT_ROWS, 1) columns via eye + lane reduction
        # (avoids an explicit transpose op).
        rr = jax.lax.broadcasted_iota(jnp.int32, (_OUT_ROWS, LB), 0)
        cc = jax.lax.broadcasted_iota(jnp.int32, (_OUT_ROWS, LB), 1)
        eye = (rr == cc).astype(jnp.float32)

        fc1_blk = p_ref[fc_base:fc_base + 8, :]     # rows 0..H-1: fc1_w^T, row H: fc1_b
        h1 = jnp.broadcast_to(fc1_blk[H:H + 1, :], (_OUT_ROWS, _LANES))
        for j in range(H):
            col_j = jnp.sum(hn_t[j:j + 1, :] * eye, axis=1, keepdims=True)  # (8, 1)
            h1 = h1 + col_j * fc1_blk[j:j + 1, :]
        h1 = jnp.maximum(h1, 0.0)                                           # (8, 128)

        fc2_w = p_ref[fc_base + 8:fc_base + 8 + _LANES, :]                  # (128, 128)
        fc2_b = p_ref[fc_base + 8 + _LANES:fc_base + 16 + _LANES, :]
        out = jnp.dot(h1, fc2_w, preferred_element_type=jnp.float32) + fc2_b[0:1, :]
        out_ref[...] = out.astype(out_ref.dtype)                            # full (8,128) tile

    return kernel


def pack_params(params, *, num_layers, in_size, hidden, num_steps_out):
    """Pack all weights/biases into one (R, 128) f32 slab. Call ONCE at model load."""
    H = hidden
    G = 4 * H
    assert H == GLOBAL_HIDDEN, "fc_1 input dim is hard-wired to global hidden_size=2"
    assert G <= 8, "gate block must fit one 8-row sublane tile"
    assert in_size <= _LANES, "in_size must fit the 128-lane w_ih block"
    assert num_steps_out <= _LANES
    assert params["fc1_w"].shape == (_LANES, H)
    assert params["fc2_w"].shape == (num_steps_out, _LANES)

    def block(mat, nrows=8):
        mat = jnp.asarray(mat, jnp.float32)
        r, c = mat.shape
        assert r <= nrows and c <= _LANES, f"block {mat.shape} exceeds ({nrows},{_LANES})"
        return jnp.zeros((nrows, _LANES), jnp.float32).at[:r, :c].set(mat)

    rows = []
    for l in range(num_layers):
        w_ih = params[f"w_ih_{l}"]                                   # (G, in_l)
        w_hh = params[f"w_hh_{l}"]                                   # (G, H)
        b = (params[f"b_ih_{l}"] + params[f"b_hh_{l}"]).reshape(G, 1)
        rows += [block(w_ih), block(w_hh), block(b)]
    fc1 = jnp.concatenate([params["fc1_w"].T,                        # (H, 128)
                           params["fc1_b"].reshape(1, -1)], axis=0)  # + (1, 128)
    rows.append(block(fc1))
    rows.append(block(params["fc2_w"].T, nrows=_LANES))              # (128, nso) -> (128,128)
    rows.append(block(params["fc2_b"].reshape(1, -1)))
    return jnp.concatenate(rows, axis=0)                             # (24*L + 144, 128)


def make_forward(*, num_layers, seq_len, batch, in_size, hidden):
    """Build the pallas_call once (model-load time). Per call: fwd(x_kern, slab)."""
    assert hidden == GLOBAL_HIDDEN
    assert seq_len * batch <= _LANES, "T*B must fit one lane tile for the x layout"
    assert num_layers * batch <= _OUT_ROWS, "L*B must fit the 8-row output tile"
    kernel = _make_kernel(num_layers, seq_len, batch, in_size, hidden)
    vmem = lambda: pl.BlockSpec(memory_space=pltpu.MemorySpace.VMEM)
    call = pl.pallas_call(
        kernel,
        out_shape=jax.ShapeDtypeStruct((_OUT_ROWS, _LANES), jnp.float32),
        in_specs=[vmem(), vmem()],
        out_specs=vmem(),
    )
    return jax.jit(call)


def init_params(key, in_size, hidden, num_layers, num_steps_out):
    """Deterministic init mirroring PyTorch parameter shapes (uniform +-1/sqrt(H))."""
    params = {}
    bound = 1.0 / float(hidden) ** 0.5
    keys = list(jax.random.split(key, 4 * num_layers + 4))
    ki = iter(keys)
    for l in range(num_layers):
        in_l = in_size if l == 0 else hidden
        params[f"w_ih_{l}"] = jax.random.uniform(next(ki), (4 * hidden, in_l), jnp.float32, -bound, bound)
        params[f"w_hh_{l}"] = jax.random.uniform(next(ki), (4 * hidden, hidden), jnp.float32, -bound, bound)
        params[f"b_ih_{l}"] = jax.random.uniform(next(ki), (4 * hidden,), jnp.float32, -bound, bound)
        params[f"b_hh_{l}"] = jax.random.uniform(next(ki), (4 * hidden,), jnp.float32, -bound, bound)
    params["fc1_w"] = jax.random.uniform(next(ki), (_LANES, GLOBAL_HIDDEN), jnp.float32, -bound, bound)
    params["fc1_b"] = jax.random.uniform(next(ki), (_LANES,), jnp.float32, -bound, bound)
    params["fc2_w"] = jax.random.uniform(next(ki), (num_steps_out, _LANES), jnp.float32, -bound, bound)
    params["fc2_b"] = jax.random.uniform(next(ki), (num_steps_out,), jnp.float32, -bound, bound)
    return params


def reference_forward(x, params, *, num_layers, hidden, num_steps_out):
    """Pure-JAX reference matching PyTorch LSTM semantics (for validation)."""
    B, T, _ = x.shape
    H = hidden
    layer_in = x.astype(jnp.float32)
    finals = []
    for l in range(num_layers):
        w_ih = params[f"w_ih_{l}"]
        w_hh = params[f"w_hh_{l}"]
        b = params[f"b_ih_{l}"] + params[f"b_hh_{l}"]
        h = jnp.zeros((B, H), jnp.float32)
        c = jnp.zeros((B, H), jnp.float32)
        outs = []
        for t in range(T):
            gates = layer_in[:, t, :] @ w_ih.T + h @ w_hh.T + b
            i_g = jax.nn.sigmoid(gates[:, 0 * H:1 * H])
            f_g = jax.nn.sigmoid(gates[:, 1 * H:2 * H])
            g_g = jnp.tanh(gates[:, 2 * H:3 * H])
            o_g = jax.nn.sigmoid(gates[:, 3 * H:4 * H])
            c = f_g * c + i_g * g_g
            h = o_g * jnp.tanh(c)
            outs.append(h)
        layer_in = jnp.stack(outs, axis=1)
        finals.append(h)
    hn = jnp.concatenate(finals, axis=0)
    out = jnp.maximum(hn, 0.0)
    out = out @ params["fc1_w"].T + params["fc1_b"]
    out = jnp.maximum(out, 0.0)
    out = out @ params["fc2_w"].T + params["fc2_b"]
    return out


if __name__ == "__main__":
    # Shapes consistent with the module's forward:
    #   x: (batch=2, seq=8, in_size=4); hidden_layer_size MUST be 2 (global hidden_size).
    batch, seq, in_size = 2, 8, 4
    hidden = GLOBAL_HIDDEN          # 2
    num_layers = 2
    num_steps_out = 3

    key = jax.random.PRNGKey(0)
    kx, kp = jax.random.split(key)
    x = jax.random.normal(kx, (batch, seq, in_size), jnp.float32)   # PyTorch (B, T, I)
    params = init_params(kp, in_size, hidden, num_layers, num_steps_out)

    # ---- model-load time (once): pack the parameter slab, build the call ----
    slab = pack_params(params, num_layers=num_layers, in_size=in_size,
                       hidden=hidden, num_steps_out=num_steps_out)
    fwd = make_forward(num_layers=num_layers, seq_len=seq, batch=batch,
                       in_size=in_size, hidden=hidden)

    # ---- producer-side layout: features along sublanes, (t, b) along lanes ----
    # x_kern[j, t*B + b] == x[b, t, j]; a real pipeline emits x in this layout directly.
    x_kern = jnp.transpose(x, (2, 1, 0)).reshape(in_size, seq * batch)

    out_pad = jax.block_until_ready(fwd(x_kern, slab))              # (8, 128) padded

    ref = reference_forward(x, params, num_layers=num_layers, hidden=hidden,
                            num_steps_out=num_steps_out)
    out = out_pad[:num_layers * batch, :num_steps_out]              # consumer-side view
    assert out.shape == (num_layers * batch, num_steps_out)
    assert jnp.allclose(out, ref, atol=5e-5, rtol=1e-4), (out, ref)

    print("KERNEL_OK")
</pallas_src>

<mosaic_0001>
module attributes {stable_mosaic.version = 11 : i64} {
  func.func @kernel(%arg0: memref<4x16xf32, #tpu.memory_space<vmem>>, %arg1: memref<192x128xf32, #tpu.memory_space<vmem>>, %arg2: memref<8x128xf32, #tpu.memory_space<vmem>>) attributes {dimension_semantics = [], scalar_prefetch = 0 : i64, scratch_operands = 0 : i64, tpu.core_type = #tpu.core_type<tc>} {
    %0 = tpu.iota {dimensions = array<i32: 0>} : vector<8x2xi32>
    %c4_i32 = arith.constant 4 : i32
    %1 = vector.broadcast %c4_i32 : i32 to vector<8x2xi32>
    %2 = arith.cmpi sge, %0, %1 : vector<8x2xi32>
    %c6_i32 = arith.constant 6 : i32
    %3 = vector.broadcast %c6_i32 : i32 to vector<8x2xi32>
    %4 = arith.cmpi slt, %0, %3 : vector<8x2xi32>
    %5 = arith.andi %2, %4 : vector<8x2xi1>
    %cst = arith.constant 1.000000e+00 : f32
    %cst_0 = arith.constant 5.000000e-01 : f32
    %6 = vector.broadcast %cst : f32 to vector<8x2xf32>
    %7 = vector.broadcast %cst_0 : f32 to vector<8x2xf32>
    %8 = arith.select %5, %6, %7 : vector<8x2xi1>, vector<8x2xf32>
    %cst_1 = arith.constant 0.000000e+00 : f32
    %cst_2 = arith.constant 5.000000e-01 : f32
    %9 = vector.broadcast %cst_1 : f32 to vector<8x2xf32>
    %10 = vector.broadcast %cst_2 : f32 to vector<8x2xf32>
    %11 = arith.select %5, %9, %10 : vector<8x2xi1>, vector<8x2xf32>
    %c0 = arith.constant 0 : index
    %c0_3 = arith.constant 0 : index
    %12 = vector.load %arg1[%c0, %c0_3] : memref<192x128xf32, #tpu.memory_space<vmem>>, vector<8x128xf32>
    %c8 = arith.constant 8 : index
    %c0_4 = arith.constant 0 : index
    %13 = vector.load %arg1[%c8, %c0_4] : memref<192x128xf32, #tpu.memory_space<vmem>>, vector<8x128xf32>
    %c16 = arith.constant 16 : index
    %c0_5 = arith.constant 0 : index
    %14 = vector.load %arg1[%c16, %c0_5] : memref<192x128xf32, #tpu.memory_space<vmem>>, vector<8x128xf32>
    %15 = vector.extract_strided_slice %13 {offsets = [0, 0], sizes = [8, 1], strides = [1, 1]} : vector<8x128xf32> to vector<8x1xf32>
    %16 = vector.shape_cast %15 : vector<8x1xf32> to vector<8x1xf32>
    %17 = vector.broadcast %16 : vector<8x1xf32> to vector<8x2xf32>
    %18 = vector.extract_strided_slice %13 {offsets = [0, 1], sizes = [8, 1], strides = [1, 1]} : vector<8x128xf32> to vector<8x1xf32>
    %19 = vector.shape_cast %18 : vector<8x1xf32> to vector<8x1xf32>
    %20 = vector.broadcast %19 : vector<8x1xf32> to vector<8x2xf32>
    %c0_6 = arith.constant 0 : index
    %c0_7 = arith.constant 0 : index
    %21 = vector.load %arg0[%c0_6, %c0_7] : memref<4x16xf32, #tpu.memory_space<vmem>>, vector<4x16xf32>
    %22 = vector.extract_strided_slice %12 {offsets = [0, 0], sizes = [8, 1], strides = [1, 1]} : vector<8x128xf32> to vector<8x1xf32>
    %23 = vector.shape_cast %22 : vector<8x1xf32> to vector<8x1xf32>
    %24 = vector.broadcast %23 : vector<8x1xf32> to vector<8x16xf32>
    %25 = vector.extract_strided_slice %12 {offsets = [0, 1], sizes = [8, 1], strides = [1, 1]} : vector<8x128xf32> to vector<8x1xf32>
    %26 = vector.shape_cast %25 : vector<8x1xf32> to vector<8x1xf32>
    %27 = vector.broadcast %26 : vector<8x1xf32> to vector<8x16xf32>
    %28 = vector.extract_strided_slice %12 {offsets = [0, 2], sizes = [8, 1], strides = [1, 1]} : vector<8x128xf32> to vector<8x1xf32>
    %29 = vector.shape_cast %28 : vector<8x1xf32> to vector<8x1xf32>
    %30 = vector.broadcast %29 : vector<8x1xf32> to vector<8x16xf32>
    %31 = vector.extract_strided_slice %12 {offsets = [0, 3], sizes = [8, 1], strides = [1, 1]} : vector<8x128xf32> to vector<8x1xf32>
    %32 = vector.shape_cast %31 : vector<8x1xf32> to vector<8x1xf32>
    %33 = vector.broadcast %32 : vector<8x1xf32> to vector<8x16xf32>
    %34 = vector.extract_strided_slice %14 {offsets = [0, 0], sizes = [8, 1], strides = [1, 1]} : vector<8x128xf32> to vector<8x1xf32>
    %35 = vector.shape_cast %34 : vector<8x1xf32> to vector<8x1xf32>
    %36 = vector.broadcast %35 : vector<8x1xf32> to vector<8x16xf32>
    %37 = vector.extract_strided_slice %21 {offsets = [0, 0], sizes = [1, 16], strides = [1, 1]} : vector<4x16xf32> to vector<1x16xf32>
    %38 = vector.broadcast %37 : vector<1x16xf32> to vector<8x16xf32>
    %39 = arith.mulf %24, %38 : vector<8x16xf32>
    %40 = arith.addf %36, %39 : vector<8x16xf32>
    %41 = vector.extract_strided_slice %21 {offsets = [1, 0], sizes = [1, 16], strides = [1, 1]} : vector<4x16xf32> to vector<1x16xf32>
    %42 = vector.broadcast %41 : vector<1x16xf32> to vector<8x16xf32>
    %43 = arith.mulf %27, %42 : vector<8x16xf32>
    %44 = arith.addf %40, %43 : vector<8x16xf32>
    %45 = vector.extract_strided_slice %21 {offsets = [2, 0], sizes = [1, 16], strides = [1, 1]} : vector<4x16xf32> to vector<1x16xf32>
    %46 = vector.broadcast %45 : vector<1x16xf32> to vector<8x16xf32>
    %47 = arith.mulf %30, %46 : vector<8x16xf32>
    %48 = arith.addf %44, %47 : vector<8x16xf32>
    %49 = vector.extract_strided_slice %21 {offsets = [3, 0], sizes = [1, 16], strides = [1, 1]} : vector<4x16xf32> to vector<1x16xf32>
    %50 = vector.broadcast %49 : vector<1x16xf32> to vector<8x16xf32>
    %51 = arith.mulf %33, %50 : vector<8x16xf32>
    %52 = arith.addf %48, %51 : vector<8x16xf32>
    %53 = vector.extract_strided_slice %52 {offsets = [0, 0], sizes = [8, 2], strides = [1, 1]} : vector<8x16xf32> to vector<8x2xf32>
    %54 = vector.extract_strided_slice %52 {offsets = [0, 2], sizes = [8, 2], strides = [1, 1]} : vector<8x16xf32> to vector<8x2xf32>
    %55 = vector.extract_strided_slice %52 {offsets = [0, 4], sizes = [8, 2], strides = [1, 1]} : vector<8x16xf32> to vector<8x2xf32>
    %56 = vector.extract_strided_slice %52 {offsets = [0, 6], sizes = [8, 2], strides = [1, 1]} : vector<8x16xf32> to vector<8x2xf32>
    %57 = vector.extract_strided_slice %52 {offsets = [0, 8], sizes = [8, 2], strides = [1, 1]} : vector<8x16xf32> to vector<8x2xf32>
    %58 = vector.extract_strided_slice %52 {offsets = [0, 10], sizes = [8, 2], strides = [1, 1]} : vector<8x16xf32> to vector<8x2xf32>
    %59 = vector.extract_strided_slice %52 {offsets = [0, 12], sizes = [8, 2], strides = [1, 1]} : vector<8x16xf32> to vector<8x2xf32>
    %60 = vector.extract_strided_slice %52 {offsets = [0, 14], sizes = [8, 2], strides = [1, 1]} : vector<8x16xf32> to vector<8x2xf32>
    %cst_8 = arith.constant 0.000000e+00 : f32
    %61 = vector.broadcast %cst_8 : f32 to vector<2x2xf32>
    %cst_9 = arith.constant 0.000000e+00 : f32
    %62 = vector.broadcast %cst_9 : f32 to vector<2x2xf32>
    %63 = vector.extract_strided_slice %61 {offsets = [0, 0], sizes = [1, 2], strides = [1, 1]} : vector<2x2xf32> to vector<1x2xf32>
    %64 = vector.broadcast %63 : vector<1x2xf32> to vector<8x2xf32>
    %65 = arith.mulf %17, %64 : vector<8x2xf32>
    %66 = arith.addf %53, %65 : vector<8x2xf32>
    %67 = vector.extract_strided_slice %61 {offsets = [1, 0], sizes = [1, 2], strides = [1, 1]} : vector<2x2xf32> to vector<1x2xf32>
    %68 = vector.broadcast %67 : vector<1x2xf32> to vector<8x2xf32>
    %69 = arith.mulf %20, %68 : vector<8x2xf32>
    %70 = arith.addf %66, %69 : vector<8x2xf32>
    %71 = arith.mulf %8, %70 : vector<8x2xf32>
    %72 = math.tanh %71 : vector<8x2xf32>
    %73 = arith.mulf %8, %72 : vector<8x2xf32>
    %74 = arith.addf %73, %11 : vector<8x2xf32>
    %75 = vector.extract_strided_slice %74 {offsets = [0, 0], sizes = [2, 2], strides = [1, 1]} : vector<8x2xf32> to vector<2x2xf32>
    %76 = vector.extract_strided_slice %74 {offsets = [2, 0], sizes = [2, 2], strides = [1, 1]} : vector<8x2xf32> to vector<2x2xf32>
    %77 = vector.extract_strided_slice %74 {offsets = [4, 0], sizes = [2, 2], strides = [1, 1]} : vector<8x2xf32> to vector<2x2xf32>
    %78 = vector.extract_strided_slice %74 {offsets = [6, 0], sizes = [2, 2], strides = [1, 1]} : vector<8x2xf32> to vector<2x2xf32>
    %79 = arith.mulf %76, %62 : vector<2x2xf32>
    %80 = arith.mulf %75, %77 : vector<2x2xf32>
    %81 = arith.addf %79, %80 : vector<2x2xf32>
    %82 = math.tanh %81 : vector<2x2xf32>
    %83 = arith.mulf %78, %82 : vector<2x2xf32>
    %84 = vector.extract_strided_slice %83 {offsets = [0, 0], sizes = [1, 2], strides = [1, 1]} : vector<2x2xf32> to vector<1x2xf32>
    %85 = vector.broadcast %84 : vector<1x2xf32> to vector<8x2xf32>
    %86 = arith.mulf %17, %85 : vector<8x2xf32>
    %87 = arith.addf %54, %86 : vector<8x2xf32>
    %88 = vector.extract_strided_slice %83 {offsets = [1, 0], sizes = [1, 2], strides = [1, 1]} : vector<2x2xf32> to vector<1x2xf32>
    %89 = vector.broadcast %88 : vector<1x2xf32> to vector<8x2xf32>
    %90 = arith.mulf %20, %89 : vector<8x2xf32>
    %91 = arith.addf %87, %90 : vector<8x2xf32>
    %92 = arith.mulf %8, %91 : vector<8x2xf32>
    %93 = math.tanh %92 : vector<8x2xf32>
    %94 = arith.mulf %8, %93 : vector<8x2xf32>
    %95 = arith.addf %94, %11 : vector<8x2xf32>
    %96 = vector.extract_strided_slice %95 {offsets = [0, 0], sizes = [2, 2], strides = [1, 1]} : vector<8x2xf32> to vector<2x2xf32>
    %97 = vector.extract_strided_slice %95 {offsets = [2, 0], sizes = [2, 2], strides = [1, 1]} : vector<8x2xf32> to vector<2x2xf32>
    %98 = vector.extract_strided_slice %95 {offsets = [4, 0], sizes = [2, 2], strides = [1, 1]} : vector<8x2xf32> to vector<2x2xf32>
    %99 = vector.extract_strided_slice %95 {offsets = [6, 0], sizes = [2, 2], strides = [1, 1]} : vector<8x2xf32> to vector<2x2xf32>
    %100 = arith.mulf %97, %81 : vector<2x2xf32>
    %101 = arith.mulf %96, %98 : vector<2x2xf32>
    %102 = arith.addf %100, %101 : vector<2x2xf32>
    %103 = math.tanh %102 : vector<2x2xf32>
    %104 = arith.mulf %99, %103 : vector<2x2xf32>
    %105 = vector.extract_strided_slice %104 {offsets = [0, 0], sizes = [1, 2], strides = [1, 1]} : vector<2x2xf32> to vector<1x2xf32>
    %106 = vector.broadcast %105 : vector<1x2xf32> to vector<8x2xf32>
    %107 = arith.mulf %17, %106 : vector<8x2xf32>
    %108 = arith.addf %55, %107 : vector<8x2xf32>
    %109 = vector.extract_strided_slice %104 {offsets = [1, 0], sizes = [1, 2], strides = [1, 1]} : vector<2x2xf32> to vector<1x2xf32>
    %110 = vector.broadcast %109 : vector<1x2xf32> to vector<8x2xf32>
    %111 = arith.mulf %20, %110 : vector<8x2xf32>
    %112 = arith.addf %108, %111 : vector<8x2xf32>
    %113 = arith.mulf %8, %112 : vector<8x2xf32>
    %114 = math.tanh %113 : vector<8x2xf32>
    %115 = arith.mulf %8, %114 : vector<8x2xf32>
    %116 = arith.addf %115, %11 : vector<8x2xf32>
    %117 = vector.extract_strided_slice %116 {offsets = [0, 0], sizes = [2, 2], strides = [1, 1]} : vector<8x2xf32> to vector<2x2xf32>
    %118 = vector.extract_strided_slice %116 {offsets = [2, 0], sizes = [2, 2], strides = [1, 1]} : vector<8x2xf32> to vector<2x2xf32>
    %119 = vector.extract_strided_slice %116 {offsets = [4, 0], sizes = [2, 2], strides = [1, 1]} : vector<8x2xf32> to vector<2x2xf32>
    %120 = vector.extract_strided_slice %116 {offsets = [6, 0], sizes = [2, 2], strides = [1, 1]} : vector<8x2xf32> to vector<2x2xf32>
    %121 = arith.mulf %118, %102 : vector<2x2xf32>
    %122 = arith.mulf %117, %119 : vector<2x2xf32>
    %123 = arith.addf %121, %122 : vector<2x2xf32>
    %124 = math.tanh %123 : vector<2x2xf32>
    %125 = arith.mulf %120, %124 : vector<2x2xf32>
    %126 = vector.extract_strided_slice %125 {offsets = [0, 0], sizes = [1, 2], strides = [1, 1]} : vector<2x2xf32> to vector<1x2xf32>
    %127 = vector.broadcast %126 : vector<1x2xf32> to vector<8x2xf32>
    %128 = arith.mulf %17, %127 : vector<8x2xf32>
    %129 = arith.addf %56, %128 : vector<8x2xf32>
    %130 = vector.extract_strided_slice %125 {offsets = [1, 0], sizes = [1, 2], strides = [1, 1]} : vector<2x2xf32> to vector<1x2xf32>
    %131 = vector.broadcast %130 : vector<1x2xf32> to vector<8x2xf32>
    %132 = arith.mulf %20, %131 : vector<8x2xf32>
    %133 = arith.addf %129, %132 : vector<8x2xf32>
    %134 = arith.mulf %8, %133 : vector<8x2xf32>
    %135 = math.tanh %134 : vector<8x2xf32>
    %136 = arith.mulf %8, %135 : vector<8x2xf32>
    %137 = arith.addf %136, %11 : vector<8x2xf32>
    %138 = vector.extract_strided_slice %137 {offsets = [0, 0], sizes = [2, 2], strides = [1, 1]} : vector<8x2xf32> to vector<2x2xf32>
    %139 = vector.extract_strided_slice %137 {offsets = [2, 0], sizes = [2, 2], strides = [1, 1]} : vector<8x2xf32> to vector<2x2xf32>
    %140 = vector.extract_strided_slice %137 {offsets = [4, 0], sizes = [2, 2], strides = [1, 1]} : vector<8x2xf32> to vector<2x2xf32>
    %141 = vector.extract_strided_slice %137 {offsets = [6, 0], sizes = [2, 2], strides = [1, 1]} : vector<8x2xf32> to vector<2x2xf32>
    %142 = arith.mulf %139, %123 : vector<2x2xf32>
    %143 = arith.mulf %138, %140 : vector<2x2xf32>
    %144 = arith.addf %142, %143 : vector<2x2xf32>
    %145 = math.tanh %144 : vector<2x2xf32>
    %146 = arith.mulf %141, %145 : vector<2x2xf32>
    %147 = vector.extract_strided_slice %146 {offsets = [0, 0], sizes = [1, 2], strides = [1, 1]} : vector<2x2xf32> to vector<1x2xf32>
    %148 = vector.broadcast %147 : vector<1x2xf32> to vector<8x2xf32>
    %149 = arith.mulf %17, %148 : vector<8x2xf32>
    %150 = arith.addf %57, %149 : vector<8x2xf32>
    %151 = vector.extract_strided_slice %146 {offsets = [1, 0], sizes = [1, 2], strides = [1, 1]} : vector<2x2xf32> to vector<1x2xf32>
    %152 = vector.broadcast %151 : vector<1x2xf32> to vector<8x2xf32>
    %153 = arith.mulf %20, %152 : vector<8x2xf32>
    %154 = arith.addf %150, %153 : vector<8x2xf32>
    %155 = arith.mulf %8, %154 : vector<8x2xf32>
    %156 = math.tanh %155 : vector<8x2xf32>
    %157 = arith.mulf %8, %156 : vector<8x2xf32>
    %158 = arith.addf %157, %11 : vector<8x2xf32>
    %159 = vector.extract_strided_slice %158 {offsets = [0, 0], sizes = [2, 2], strides = [1, 1]} : vector<8x2xf32> to vector<2x2xf32>
    %160 = vector.extract_strided_slice %158 {offsets = [2, 0], sizes = [2, 2], strides = [1, 1]} : vector<8x2xf32> to vector<2x2xf32>
    %161 = vector.extract_strided_slice %158 {offsets = [4, 0], sizes = [2, 2], strides = [1, 1]} : vector<8x2xf32> to vector<2x2xf32>
    %162 = vector.extract_strided_slice %158 {offsets = [6, 0], sizes = [2, 2], strides = [1, 1]} : vector<8x2xf32> to vector<2x2xf32>
    %163 = arith.mulf %160, %144 : vector<2x2xf32>
    %164 = arith.mulf %159, %161 : vector<2x2xf32>
    %165 = arith.addf %163, %164 : vector<2x2xf32>
    %166 = math.tanh %165 : vector<2x2xf32>
    %167 = arith.mulf %162, %166 : vector<2x2xf32>
    %168 = vector.extract_strided_slice %167 {offsets = [0, 0], sizes = [1, 2], strides = [1, 1]} : vector<2x2xf32> to vector<1x2xf32>
    %169 = vector.broadcast %168 : vector<1x2xf32> to vector<8x2xf32>
    %170 = arith.mulf %17, %169 : vector<8x2xf32>
    %171 = arith.addf %58, %170 : vector<8x2xf32>
    %172 = vector.extract_strided_slice %167 {offsets = [1, 0], sizes = [1, 2], strides = [1, 1]} : vector<2x2xf32> to vector<1x2xf32>
    %173 = vector.broadcast %172 : vector<1x2xf32> to vector<8x2xf32>
    %174 = arith.mulf %20, %173 : vector<8x2xf32>
    %175 = arith.addf %171, %174 : vector<8x2xf32>
    %176 = arith.mulf %8, %175 : vector<8x2xf32>
    %177 = math.tanh %176 : vector<8x2xf32>
    %178 = arith.mulf %8, %177 : vector<8x2xf32>
    %179 = arith.addf %178, %11 : vector<8x2xf32>
    %180 = vector.extract_strided_slice %179 {offsets = [0, 0], sizes = [2, 2], strides = [1, 1]} : vector<8x2xf32> to vector<2x2xf32>
    %181 = vector.extract_strided_slice %179 {offsets = [2, 0], sizes = [2, 2], strides = [1, 1]} : vector<8x2xf32> to vector<2x2xf32>
    %182 = vector.extract_strided_slice %179 {offsets = [4, 0], sizes = [2, 2], strides = [1, 1]} : vector<8x2xf32> to vector<2x2xf32>
    %183 = vector.extract_strided_slice %179 {offsets = [6, 0], sizes = [2, 2], strides = [1, 1]} : vector<8x2xf32> to vector<2x2xf32>
    %184 = arith.mulf %181, %165 : vector<2x2xf32>
    %185 = arith.mulf %180, %182 : vector<2x2xf32>
    %186 = arith.addf %184, %185 : vector<2x2xf32>
    %187 = math.tanh %186 : vector<2x2xf32>
    %188 = arith.mulf %183, %187 : vector<2x2xf32>
    %189 = vector.extract_strided_slice %188 {offsets = [0, 0], sizes = [1, 2], strides = [1, 1]} : vector<2x2xf32> to vector<1x2xf32>
    %190 = vector.broadcast %189 : vector<1x2xf32> to vector<8x2xf32>
    %191 = arith.mulf %17, %190 : vector<8x2xf32>
    %192 = arith.addf %59, %191 : vector<8x2xf32>
    %193 = vector.extract_strided_slice %188 {offsets = [1, 0], sizes = [1, 2], strides = [1, 1]} : vector<2x2xf32> to vector<1x2xf32>
    %194 = vector.broadcast %193 : vector<1x2xf32> to vector<8x2xf32>
    %195 = arith.mulf %20, %194 : vector<8x2xf32>
    %196 = arith.addf %192, %195 : vector<8x2xf32>
    %197 = arith.mulf %8, %196 : vector<8x2xf32>
    %198 = math.tanh %197 : vector<8x2xf32>
    %199 = arith.mulf %8, %198 : vector<8x2xf32>
    %200 = arith.addf %199, %11 : vector<8x2xf32>
    %201 = vector.extract_strided_slice %200 {offsets = [0, 0], sizes = [2, 2], strides = [1, 1]} : vector<8x2xf32> to vector<2x2xf32>
    %202 = vector.extract_strided_slice %200 {offsets = [2, 0], sizes = [2, 2], strides = [1, 1]} : vector<8x2xf32> to vector<2x2xf32>
    %203 = vector.extract_strided_slice %200 {offsets = [4, 0], sizes = [2, 2], strides = [1, 1]} : vector<8x2xf32> to vector<2x2xf32>
    %204 = vector.extract_strided_slice %200 {offsets = [6, 0], sizes = [2, 2], strides = [1, 1]} : vector<8x2xf32> to vector<2x2xf32>
    %205 = arith.mulf %202, %186 : vector<2x2xf32>
    %206 = arith.mulf %201, %203 : vector<2x2xf32>
    %207 = arith.addf %205, %206 : vector<2x2xf32>
    %208 = math.tanh %207 : vector<2x2xf32>
    %209 = arith.mulf %204, %208 : vector<2x2xf32>
    %210 = vector.extract_strided_slice %209 {offsets = [0, 0], sizes = [1, 2], strides = [1, 1]} : vector<2x2xf32> to vector<1x2xf32>
    %211 = vector.broadcast %210 : vector<1x2xf32> to vector<8x2xf32>
    %212 = arith.mulf %17, %211 : vector<8x2xf32>
    %213 = arith.addf %60, %212 : vector<8x2xf32>
    %214 = vector.extract_strided_slice %209 {offsets = [1, 0], sizes = [1, 2], strides = [1, 1]} : vector<2x2xf32> to vector<1x2xf32>
    %215 = vector.broadcast %214 : vector<1x2xf32> to vector<8x2xf32>
    %216 = arith.mulf %20, %215 : vector<8x2xf32>
    %217 = arith.addf %213, %216 : vector<8x2xf32>
    %218 = arith.mulf %8, %217 : vector<8x2xf32>
    %219 = math.tanh %218 : vector<8x2xf32>
    %220 = arith.mulf %8, %219 : vector<8x2xf32>
    %221 = arith.addf %220, %11 : vector<8x2xf32>
    %222 = vector.extract_strided_slice %221 {offsets = [0, 0], sizes = [2, 2], strides = [1, 1]} : vector<8x2xf32> to vector<2x2xf32>
    %223 = vector.extract_strided_slice %221 {offsets = [2, 0], sizes = [2, 2], strides = [1, 1]} : vector<8x2xf32> to vector<2x2xf32>
    %224 = vector.extract_strided_slice %221 {offsets = [4, 0], sizes = [2, 2], strides = [1, 1]} : vector<8x2xf32> to vector<2x2xf32>
    %225 = vector.extract_strided_slice %221 {offsets = [6, 0], sizes = [2, 2], strides = [1, 1]} : vector<8x2xf32> to vector<2x2xf32>
    %226 = arith.mulf %223, %207 : vector<2x2xf32>
    %227 = arith.mulf %222, %224 : vector<2x2xf32>
    %228 = arith.addf %226, %227 : vector<2x2xf32>
    %229 = math.tanh %228 : vector<2x2xf32>
    %230 = arith.mulf %225, %229 : vector<2x2xf32>
    %c24 = arith.constant 24 : index
    %c0_10 = arith.constant 0 : index
    %231 = vector.load %arg1[%c24, %c0_10] : memref<192x128xf32, #tpu.memory_space<vmem>>, vector<8x128xf32>
    %c32 = arith.constant 32 : index
    %c0_11 = arith.constant 0 : index
    %232 = vector.load %arg1[%c32, %c0_11] : memref<192x128xf32, #tpu.memory_space<vmem>>, vector<8x128xf32>
    %c40 = arith.constant 40 : index
    %c0_12 = arith.constant 0 : index
    %233 = vector.load %arg1[%c40, %c0_12] : memref<192x128xf32, #tpu.memory_space<vmem>>, vector<8x128xf32>
    %234 = vector.extract_strided_slice %232 {offsets = [0, 0], sizes = [8, 1], strides = [1, 1]} : vector<8x128xf32> to vector<8x1xf32>
    %235 = vector.shape_cast %234 : vector<8x1xf32> to vector<8x1xf32>
    %236 = vector.broadcast %235 : vector<8x1xf32> to vector<8x2xf32>
    %237 = vector.extract_strided_slice %232 {offsets = [0, 1], sizes = [8, 1], strides = [1, 1]} : vector<8x128xf32> to vector<8x1xf32>
    %238 = vector.shape_cast %237 : vector<8x1xf32> to vector<8x1xf32>
    %239 = vector.broadcast %238 : vector<8x1xf32> to vector<8x2xf32>
    %240 = vector.extract_strided_slice %233 {offsets = [0, 0], sizes = [8, 1], strides = [1, 1]} : vector<8x128xf32> to vector<8x1xf32>
    %241 = vector.shape_cast %240 : vector<8x1xf32> to vector<8x1xf32>
    %242 = vector.broadcast %241 : vector<8x1xf32> to vector<8x2xf32>
    %243 = vector.extract_strided_slice %231 {offsets = [0, 0], sizes = [8, 1], strides = [1, 1]} : vector<8x128xf32> to vector<8x1xf32>
    %244 = vector.shape_cast %243 : vector<8x1xf32> to vector<8x1xf32>
    %245 = vector.broadcast %244 : vector<8x1xf32> to vector<8x2xf32>
    %246 = vector.extract_strided_slice %231 {offsets = [0, 1], sizes = [8, 1], strides = [1, 1]} : vector<8x128xf32> to vector<8x1xf32>
    %247 = vector.shape_cast %246 : vector<8x1xf32> to vector<8x1xf32>
    %248 = vector.broadcast %247 : vector<8x1xf32> to vector<8x2xf32>
    %249 = vector.extract_strided_slice %83 {offsets = [0, 0], sizes = [1, 2], strides = [1, 1]} : vector<2x2xf32> to vector<1x2xf32>
    %250 = vector.broadcast %249 : vector<1x2xf32> to vector<8x2xf32>
    %251 = arith.mulf %245, %250 : vector<8x2xf32>
    %252 = arith.addf %242, %251 : vector<8x2xf32>
    %253 = vector.extract_strided_slice %83 {offsets = [1, 0], sizes = [1, 2], strides = [1, 1]} : vector<2x2xf32> to vector<1x2xf32>
    %254 = vector.broadcast %253 : vector<1x2xf32> to vector<8x2xf32>
    %255 = arith.mulf %248, %254 : vector<8x2xf32>
    %256 = arith.addf %252, %255 : vector<8x2xf32>
    %257 = vector.extract_strided_slice %104 {offsets = [0, 0], sizes = [1, 2], strides = [1, 1]} : vector<2x2xf32> to vector<1x2xf32>
    %258 = vector.broadcast %257 : vector<1x2xf32> to vector<8x2xf32>
    %259 = arith.mulf %245, %258 : vector<8x2xf32>
    %260 = arith.addf %242, %259 : vector<8x2xf32>
    %261 = vector.extract_strided_slice %104 {offsets = [1, 0], sizes = [1, 2], strides = [1, 1]} : vector<2x2xf32> to vector<1x2xf32>
    %262 = vector.broadcast %261 : vector<1x2xf32> to vector<8x2xf32>
    %263 = arith.mulf %248, %262 : vector<8x2xf32>
    %264 = arith.addf %260, %263 : vector<8x2xf32>
    %265 = vector.extract_strided_slice %125 {offsets = [0, 0], sizes = [1, 2], strides = [1, 1]} : vector<2x2xf32> to vector<1x2xf32>
    %266 = vector.broadcast %265 : vector<1x2xf32> to vector<8x2xf32>
    %267 = arith.mulf %245, %266 : vector<8x2xf32>
    %268 = arith.addf %242, %267 : vector<8x2xf32>
    %269 = vector.extract_strided_slice %125 {offsets = [1, 0], sizes = [1, 2], strides = [1, 1]} : vector<2x2xf32> to vector<1x2xf32>
    %270 = vector.broadcast %269 : vector<1x2xf32> to vector<8x2xf32>
    %271 = arith.mulf %248, %270 : vector<8x2xf32>
    %272 = arith.addf %268, %271 : vector<8x2xf32>
    %273 = vector.extract_strided_slice %146 {offsets = [0, 0], sizes = [1, 2], strides = [1, 1]} : vector<2x2xf32> to vector<1x2xf32>
    %274 = vector.broadcast %273 : vector<1x2xf32> to vector<8x2xf32>
    %275 = arith.mulf %245, %274 : vector<8x2xf32>
    %276 = arith.addf %242, %275 : vector<8x2xf32>
    %277 = vector.extract_strided_slice %146 {offsets = [1, 0], sizes = [1, 2], strides = [1, 1]} : vector<2x2xf32> to vector<1x2xf32>
    %278 = vector.broadcast %277 : vector<1x2xf32> to vector<8x2xf32>
    %279 = arith.mulf %248, %278 : vector<8x2xf32>
    %280 = arith.addf %276, %279 : vector<8x2xf32>
    %281 = vector.extract_strided_slice %167 {offsets = [0, 0], sizes = [1, 2], strides = [1, 1]} : vector<2x2xf32> to vector<1x2xf32>
    %282 = vector.broadcast %281 : vector<1x2xf32> to vector<8x2xf32>
    %283 = arith.mulf %245, %282 : vector<8x2xf32>
    %284 = arith.addf %242, %283 : vector<8x2xf32>
    %285 = vector.extract_strided_slice %167 {offsets = [1, 0], sizes = [1, 2], strides = [1, 1]} : vector<2x2xf32> to vector<1x2xf32>
    %286 = vector.broadcast %285 : vector<1x2xf32> to vector<8x2xf32>
    %287 = arith.mulf %248, %286 : vector<8x2xf32>
    %288 = arith.addf %284, %287 : vector<8x2xf32>
    %289 = vector.extract_strided_slice %188 {offsets = [0, 0], sizes = [1, 2], strides = [1, 1]} : vector<2x2xf32> to vector<1x2xf32>
    %290 = vector.broadcast %289 : vector<1x2xf32> to vector<8x2xf32>
    %291 = arith.mulf %245, %290 : vector<8x2xf32>
    %292 = arith.addf %242, %291 : vector<8x2xf32>
    %293 = vector.extract_strided_slice %188 {offsets = [1, 0], sizes = [1, 2], strides = [1, 1]} : vector<2x2xf32> to vector<1x2xf32>
    %294 = vector.broadcast %293 : vector<1x2xf32> to vector<8x2xf32>
    %295 = arith.mulf %248, %294 : vector<8x2xf32>
    %296 = arith.addf %292, %295 : vector<8x2xf32>
    %297 = vector.extract_strided_slice %209 {offsets = [0, 0], sizes = [1, 2], strides = [1, 1]} : vector<2x2xf32> to vector<1x2xf32>
    %298 = vector.broadcast %297 : vector<1x2xf32> to vector<8x2xf32>
    %299 = arith.mulf %245, %298 : vector<8x2xf32>
    %300 = arith.addf %242, %299 : vector<8x2xf32>
    %301 = vector.extract_strided_slice %209 {offsets = [1, 0], sizes = [1, 2], strides = [1, 1]} : vector<2x2xf32> to vector<1x2xf32>
    %302 = vector.broadcast %301 : vector<1x2xf32> to vector<8x2xf32>
    %303 = arith.mulf %248, %302 : vector<8x2xf32>
    %304 = arith.addf %300, %303 : vector<8x2xf32>
    %305 = vector.extract_strided_slice %230 {offsets = [0, 0], sizes = [1, 2], strides = [1, 1]} : vector<2x2xf32> to vector<1x2xf32>
    %306 = vector.broadcast %305 : vector<1x2xf32> to vector<8x2xf32>
    %307 = arith.mulf %245, %306 : vector<8x2xf32>
    %308 = arith.addf %242, %307 : vector<8x2xf32>
    %309 = vector.extract_strided_slice %230 {offsets = [1, 0], sizes = [1, 2], strides = [1, 1]} : vector<2x2xf32> to vector<1x2xf32>
    %310 = vector.broadcast %309 : vector<1x2xf32> to vector<8x2xf32>
    %311 = arith.mulf %248, %310 : vector<8x2xf32>
    %312 = arith.addf %308, %311 : vector<8x2xf32>
    %cst_13 = arith.constant 0.000000e+00 : f32
    %313 = vector.broadcast %cst_13 : f32 to vector<2x2xf32>
    %cst_14 = arith.constant 0.000000e+00 : f32
    %314 = vector.broadcast %cst_14 : f32 to vector<2x2xf32>
    %315 = vector.extract_strided_slice %313 {offsets = [0, 0], sizes = [1, 2], strides = [1, 1]} : vector<2x2xf32> to vector<1x2xf32>
    %316 = vector.broadcast %315 : vector<1x2xf32> to vector<8x2xf32>
    %317 = arith.mulf %236, %316 : vector<8x2xf32>
    %318 = arith.addf %256, %317 : vector<8x2xf32>
    %319 = vector.extract_strided_slice %313 {offsets = [1, 0], sizes = [1, 2], strides = [1, 1]} : vector<2x2xf32> to vector<1x2xf32>
    %320 = vector.broadcast %319 : vector<1x2xf32> to vector<8x2xf32>
    %321 = arith.mulf %239, %320 : vector<8x2xf32>
    %322 = arith.addf %318, %321 : vector<8x2xf32>
    %323 = arith.mulf %8, %322 : vector<8x2xf32>
    %324 = math.tanh %323 : vector<8x2xf32>
    %325 = arith.mulf %8, %324 : vector<8x2xf32>
    %326 = arith.addf %325, %11 : vector<8x2xf32>
    %327 = vector.extract_strided_slice %326 {offsets = [0, 0], sizes = [2, 2], strides = [1, 1]} : vector<8x2xf32> to vector<2x2xf32>
    %328 = vector.extract_strided_slice %326 {offsets = [2, 0], sizes = [2, 2], strides = [1, 1]} : vector<8x2xf32> to vector<2x2xf32>
    %329 = vector.extract_strided_slice %326 {offsets = [4, 0], sizes = [2, 2], strides = [1, 1]} : vector<8x2xf32> to vector<2x2xf32>
    %330 = vector.extract_strided_slice %326 {offsets = [6, 0], sizes = [2, 2], strides = [1, 1]} : vector<8x2xf32> to vector<2x2xf32>
    %331 = arith.mulf %328, %314 : vector<2x2xf32>
    %332 = arith.mulf %327, %329 : vector<2x2xf32>
    %333 = arith.addf %331, %332 : vector<2x2xf32>
    %334 = math.tanh %333 : vector<2x2xf32>
    %335 = arith.mulf %330, %334 : vector<2x2xf32>
    %336 = vector.extract_strided_slice %335 {offsets = [0, 0], sizes = [1, 2], strides = [1, 1]} : vector<2x2xf32> to vector<1x2xf32>
    %337 = vector.broadcast %336 : vector<1x2xf32> to vector<8x2xf32>
    %338 = arith.mulf %236, %337 : vector<8x2xf32>
    %339 = arith.addf %264, %338 : vector<8x2xf32>
    %340 = vector.extract_strided_slice %335 {offsets = [1, 0], sizes = [1, 2], strides = [1, 1]} : vector<2x2xf32> to vector<1x2xf32>
    %341 = vector.broadcast %340 : vector<1x2xf32> to vector<8x2xf32>
    %342 = arith.mulf %239, %341 : vector<8x2xf32>
    %343 = arith.addf %339, %342 : vector<8x2xf32>
    %344 = arith.mulf %8, %343 : vector<8x2xf32>
    %345 = math.tanh %344 : vector<8x2xf32>
    %346 = arith.mulf %8, %345 : vector<8x2xf32>
    %347 = arith.addf %346, %11 : vector<8x2xf32>
    %348 = vector.extract_strided_slice %347 {offsets = [0, 0], sizes = [2, 2], strides = [1, 1]} : vector<8x2xf32> to vector<2x2xf32>
    %349 = vector.extract_strided_slice %347 {offsets = [2, 0], sizes = [2, 2], strides = [1, 1]} : vector<8x2xf32> to vector<2x2xf32>
    %350 = vector.extract_strided_slice %347 {offsets = [4, 0], sizes = [2, 2], strides = [1, 1]} : vector<8x2xf32> to vector<2x2xf32>
    %351 = vector.extract_strided_slice %347 {offsets = [6, 0], sizes = [2, 2], strides = [1, 1]} : vector<8x2xf32> to vector<2x2xf32>
    %352 = arith.mulf %349, %333 : vector<2x2xf32>
    %353 = arith.mulf %348, %350 : vector<2x2xf32>
    %354 = arith.addf %352, %353 : vector<2x2xf32>
    %355 = math.tanh %354 : vector<2x2xf32>
    %356 = arith.mulf %351, %355 : vector<2x2xf32>
    %357 = vector.extract_strided_slice %356 {offsets = [0, 0], sizes = [1, 2], strides = [1, 1]} : vector<2x2xf32> to vector<1x2xf32>
    %358 = vector.broadcast %357 : vector<1x2xf32> to vector<8x2xf32>
    %359 = arith.mulf %236, %358 : vector<8x2xf32>
    %360 = arith.addf %272, %359 : vector<8x2xf32>
    %361 = vector.extract_strided_slice %356 {offsets = [1, 0], sizes = [1, 2], strides = [1, 1]} : vector<2x2xf32> to vector<1x2xf32>
    %362 = vector.broadcast %361 : vector<1x2xf32> to vector<8x2xf32>
    %363 = arith.mulf %239, %362 : vector<8x2xf32>
    %364 = arith.addf %360, %363 : vector<8x2xf32>
    %365 = arith.mulf %8, %364 : vector<8x2xf32>
    %366 = math.tanh %365 : vector<8x2xf32>
    %367 = arith.mulf %8, %366 : vector<8x2xf32>
    %368 = arith.addf %367, %11 : vector<8x2xf32>
    %369 = vector.extract_strided_slice %368 {offsets = [0, 0], sizes = [2, 2], strides = [1, 1]} : vector<8x2xf32> to vector<2x2xf32>
    %370 = vector.extract_strided_slice %368 {offsets = [2, 0], sizes = [2, 2], strides = [1, 1]} : vector<8x2xf32> to vector<2x2xf32>
    %371 = vector.extract_strided_slice %368 {offsets = [4, 0], sizes = [2, 2], strides = [1, 1]} : vector<8x2xf32> to vector<2x2xf32>
    %372 = vector.extract_strided_slice %368 {offsets = [6, 0], sizes = [2, 2], strides = [1, 1]} : vector<8x2xf32> to vector<2x2xf32>
    %373 = arith.mulf %370, %354 : vector<2x2xf32>
    %374 = arith.mulf %369, %371 : vector<2x2xf32>
    %375 = arith.addf %373, %374 : vector<2x2xf32>
    %376 = math.tanh %375 : vector<2x2xf32>
    %377 = arith.mulf %372, %376 : vector<2x2xf32>
    %378 = vector.extract_strided_slice %377 {offsets = [0, 0], sizes = [1, 2], strides = [1, 1]} : vector<2x2xf32> to vector<1x2xf32>
    %379 = vector.broadcast %378 : vector<1x2xf32> to vector<8x2xf32>
    %380 = arith.mulf %236, %379 : vector<8x2xf32>
    %381 = arith.addf %280, %380 : vector<8x2xf32>
    %382 = vector.extract_strided_slice %377 {offsets = [1, 0], sizes = [1, 2], strides = [1, 1]} : vector<2x2xf32> to vector<1x2xf32>
    %383 = vector.broadcast %382 : vector<1x2xf32> to vector<8x2xf32>
    %384 = arith.mulf %239, %383 : vector<8x2xf32>
    %385 = arith.addf %381, %384 : vector<8x2xf32>
    %386 = arith.mulf %8, %385 : vector<8x2xf32>
    %387 = math.tanh %386 : vector<8x2xf32>
    %388 = arith.mulf %8, %387 : vector<8x2xf32>
    %389 = arith.addf %388, %11 : vector<8x2xf32>
    %390 = vector.extract_strided_slice %389 {offsets = [0, 0], sizes = [2, 2], strides = [1, 1]} : vector<8x2xf32> to vector<2x2xf32>
    %391 = vector.extract_strided_slice %389 {offsets = [2, 0], sizes = [2, 2], strides = [1, 1]} : vector<8x2xf32> to vector<2x2xf32>
    %392 = vector.extract_strided_slice %389 {offsets = [4, 0], sizes = [2, 2], strides = [1, 1]} : vector<8x2xf32> to vector<2x2xf32>
    %393 = vector.extract_strided_slice %389 {offsets = [6, 0], sizes = [2, 2], strides = [1, 1]} : vector<8x2xf32> to vector<2x2xf32>
    %394 = arith.mulf %391, %375 : vector<2x2xf32>
    %395 = arith.mulf %390, %392 : vector<2x2xf32>
    %396 = arith.addf %394, %395 : vector<2x2xf32>
    %397 = math.tanh %396 : vector<2x2xf32>
    %398 = arith.mulf %393, %397 : vector<2x2xf32>
    %399 = vector.extract_strided_slice %398 {offsets = [0, 0], sizes = [1, 2], strides = [1, 1]} : vector<2x2xf32> to vector<1x2xf32>
    %400 = vector.broadcast %399 : vector<1x2xf32> to vector<8x2xf32>
    %401 = arith.mulf %236, %400 : vector<8x2xf32>
    %402 = arith.addf %288, %401 : vector<8x2xf32>
    %403 = vector.extract_strided_slice %398 {offsets = [1, 0], sizes = [1, 2], strides = [1, 1]} : vector<2x2xf32> to vector<1x2xf32>
    %404 = vector.broadcast %403 : vector<1x2xf32> to vector<8x2xf32>
    %405 = arith.mulf %239, %404 : vector<8x2xf32>
    %406 = arith.addf %402, %405 : vector<8x2xf32>
    %407 = arith.mulf %8, %406 : vector<8x2xf32>
    %408 = math.tanh %407 : vector<8x2xf32>
    %409 = arith.mulf %8, %408 : vector<8x2xf32>
    %410 = arith.addf %409, %11 : vector<8x2xf32>
    %411 = vector.extract_strided_slice %410 {offsets = [0, 0], sizes = [2, 2], strides = [1, 1]} : vector<8x2xf32> to vector<2x2xf32>
    %412 = vector.extract_strided_slice %410 {offsets = [2, 0], sizes = [2, 2], strides = [1, 1]} : vector<8x2xf32> to vector<2x2xf32>
    %413 = vector.extract_strided_slice %410 {offsets = [4, 0], sizes = [2, 2], strides = [1, 1]} : vector<8x2xf32> to vector<2x2xf32>
    %414 = vector.extract_strided_slice %410 {offsets = [6, 0], sizes = [2, 2], strides = [1, 1]} : vector<8x2xf32> to vector<2x2xf32>
    %415 = arith.mulf %412, %396 : vector<2x2xf32>
    %416 = arith.mulf %411, %413 : vector<2x2xf32>
    %417 = arith.addf %415, %416 : vector<2x2xf32>
    %418 = math.tanh %417 : vector<2x2xf32>
    %419 = arith.mulf %414, %418 : vector<2x2xf32>
    %420 = vector.extract_strided_slice %419 {offsets = [0, 0], sizes = [1, 2], strides = [1, 1]} : vector<2x2xf32> to vector<1x2xf32>
    %421 = vector.broadcast %420 : vector<1x2xf32> to vector<8x2xf32>
    %422 = arith.mulf %236, %421 : vector<8x2xf32>
    %423 = arith.addf %296, %422 : vector<8x2xf32>
    %424 = vector.extract_strided_slice %419 {offsets = [1, 0], sizes = [1, 2], strides = [1, 1]} : vector<2x2xf32> to vector<1x2xf32>
    %425 = vector.broadcast %424 : vector<1x2xf32> to vector<8x2xf32>
    %426 = arith.mulf %239, %425 : vector<8x2xf32>
    %427 = arith.addf %423, %426 : vector<8x2xf32>
    %428 = arith.mulf %8, %427 : vector<8x2xf32>
    %429 = math.tanh %428 : vector<8x2xf32>
    %430 = arith.mulf %8, %429 : vector<8x2xf32>
    %431 = arith.addf %430, %11 : vector<8x2xf32>
    %432 = vector.extract_strided_slice %431 {offsets = [0, 0], sizes = [2, 2], strides = [1, 1]} : vector<8x2xf32> to vector<2x2xf32>
    %433 = vector.extract_strided_slice %431 {offsets = [2, 0], sizes = [2, 2], strides = [1, 1]} : vector<8x2xf32> to vector<2x2xf32>
    %434 = vector.extract_strided_slice %431 {offsets = [4, 0], sizes = [2, 2], strides = [1, 1]} : vector<8x2xf32> to vector<2x2xf32>
    %435 = vector.extract_strided_slice %431 {offsets = [6, 0], sizes = [2, 2], strides = [1, 1]} : vector<8x2xf32> to vector<2x2xf32>
    %436 = arith.mulf %433, %417 : vector<2x2xf32>
    %437 = arith.mulf %432, %434 : vector<2x2xf32>
    %438 = arith.addf %436, %437 : vector<2x2xf32>
    %439 = math.tanh %438 : vector<2x2xf32>
    %440 = arith.mulf %435, %439 : vector<2x2xf32>
    %441 = vector.extract_strided_slice %440 {offsets = [0, 0], sizes = [1, 2], strides = [1, 1]} : vector<2x2xf32> to vector<1x2xf32>
    %442 = vector.broadcast %441 : vector<1x2xf32> to vector<8x2xf32>
    %443 = arith.mulf %236, %442 : vector<8x2xf32>
    %444 = arith.addf %304, %443 : vector<8x2xf32>
    %445 = vector.extract_strided_slice %440 {offsets = [1, 0], sizes = [1, 2], strides = [1, 1]} : vector<2x2xf32> to vector<1x2xf32>
    %446 = vector.broadcast %445 : vector<1x2xf32> to vector<8x2xf32>
    %447 = arith.mulf %239, %446 : vector<8x2xf32>
    %448 = arith.addf %444, %447 : vector<8x2xf32>
    %449 = arith.mulf %8, %448 : vector<8x2xf32>
    %450 = math.tanh %449 : vector<8x2xf32>
    %451 = arith.mulf %8, %450 : vector<8x2xf32>
    %452 = arith.addf %451, %11 : vector<8x2xf32>
    %453 = vector.extract_strided_slice %452 {offsets = [0, 0], sizes = [2, 2], strides = [1, 1]} : vector<8x2xf32> to vector<2x2xf32>
    %454 = vector.extract_strided_slice %452 {offsets = [2, 0], sizes = [2, 2], strides = [1, 1]} : vector<8x2xf32> to vector<2x2xf32>
    %455 = vector.extract_strided_slice %452 {offsets = [4, 0], sizes = [2, 2], strides = [1, 1]} : vector<8x2xf32> to vector<2x2xf32>
    %456 = vector.extract_strided_slice %452 {offsets = [6, 0], sizes = [2, 2], strides = [1, 1]} : vector<8x2xf32> to vector<2x2xf32>
    %457 = arith.mulf %454, %438 : vector<2x2xf32>
    %458 = arith.mulf %453, %455 : vector<2x2xf32>
    %459 = arith.addf %457, %458 : vector<2x2xf32>
    %460 = math.tanh %459 : vector<2x2xf32>
    %461 = arith.mulf %456, %460 : vector<2x2xf32>
    %462 = vector.extract_strided_slice %461 {offsets = [0, 0], sizes = [1, 2], strides = [1, 1]} : vector<2x2xf32> to vector<1x2xf32>
    %463 = vector.broadcast %462 : vector<1x2xf32> to vector<8x2xf32>
    %464 = arith.mulf %236, %463 : vector<8x2xf32>
    %465 = arith.addf %312, %464 : vector<8x2xf32>
    %466 = vector.extract_strided_slice %461 {offsets = [1, 0], sizes = [1, 2], strides = [1, 1]} : vector<2x2xf32> to vector<1x2xf32>
    %467 = vector.broadcast %466 : vector<1x2xf32> to vector<8x2xf32>
    %468 = arith.mulf %239, %467 : vector<8x2xf32>
    %469 = arith.addf %465, %468 : vector<8x2xf32>
    %470 = arith.mulf %8, %469 : vector<8x2xf32>
    %471 = math.tanh %470 : vector<8x2xf32>
    %472 = arith.mulf %8, %471 : vector<8x2xf32>
    %473 = arith.addf %472, %11 : vector<8x2xf32>
    %474 = vector.extract_strided_slice %473 {offsets = [0, 0], sizes = [2, 2], strides = [1, 1]} : vector<8x2xf32> to vector<2x2xf32>
    %475 = vector.extract_strided_slice %473 {offsets = [2, 0], sizes = [2, 2], strides = [1, 1]} : vector<8x2xf32> to vector<2x2xf32>
    %476 = vector.extract_strided_slice %473 {offsets = [4, 0], sizes = [2, 2], strides = [1, 1]} : vector<8x2xf32> to vector<2x2xf32>
    %477 = vector.extract_strided_slice %473 {offsets = [6, 0], sizes = [2, 2], strides = [1, 1]} : vector<8x2xf32> to vector<2x2xf32>
    %478 = arith.mulf %475, %459 : vector<2x2xf32>
    %479 = arith.mulf %474, %476 : vector<2x2xf32>
    %480 = arith.addf %478, %479 : vector<2x2xf32>
    %481 = math.tanh %480 : vector<2x2xf32>
    %482 = arith.mulf %477, %481 : vector<2x2xf32>
    %483 = tpu.concatenate %230, %482 in 1 : vector<2x2xf32>, vector<2x2xf32> -> vector<2x4xf32>
    %cst_15 = arith.constant 0.000000e+00 : f32
    %484 = vector.broadcast %cst_15 : f32 to vector<2x4xf32>
    %485 = arith.maximumf %483, %484 : vector<2x4xf32>
    %486 = tpu.iota {dimensions = array<i32: 0>} : vector<8x4xi32>
    %487 = tpu.iota {dimensions = array<i32: 1>} : vector<8x4xi32>
    %488 = arith.cmpi eq, %486, %487 : vector<8x4xi32>
    %489 = arith.extui %488 : vector<8x4xi1> to vector<8x4xi32>
    %490 = arith.sitofp %489 : vector<8x4xi32> to vector<8x4xf32>
    %c48 = arith.constant 48 : index
    %c0_16 = arith.constant 0 : index
    %491 = vector.load %arg1[%c48, %c0_16] : memref<192x128xf32, #tpu.memory_space<vmem>>, vector<8x128xf32>
    %492 = vector.extract_strided_slice %491 {offsets = [2, 0], sizes = [1, 128], strides = [1, 1]} : vector<8x128xf32> to vector<1x128xf32>
    %493 = vector.shape_cast %492 : vector<1x128xf32> to vector<1x128xf32>
    %494 = vector.broadcast %493 : vector<1x128xf32> to vector<8x128xf32>
    %495 = vector.extract_strided_slice %485 {offsets = [0, 0], sizes = [1, 4], strides = [1, 1]} : vector<2x4xf32> to vector<1x4xf32>
    %496 = vector.broadcast %495 : vector<1x4xf32> to vector<8x4xf32>
    %497 = arith.mulf %496, %490 : vector<8x4xf32>
    %cst_17 = arith.constant dense<0.000000e+00> : vector<8xf32>
    %498 = vector.multi_reduction <add>, %497, %cst_17 [1] : vector<8x4xf32> to vector<8xf32>
    %499 = vector.shape_cast %498 : vector<8xf32> to vector<8x1xf32>
    %500 = vector.extract_strided_slice %491 {offsets = [0, 0], sizes = [1, 128], strides = [1, 1]} : vector<8x128xf32> to vector<1x128xf32>
    %501 = vector.broadcast %499 : vector<8x1xf32> to vector<8x128xf32>
    %502 = vector.broadcast %500 : vector<1x128xf32> to vector<8x128xf32>
    %503 = arith.mulf %501, %502 : vector<8x128xf32>
    %504 = arith.addf %494, %503 : vector<8x128xf32>
    %505 = vector.extract_strided_slice %485 {offsets = [1, 0], sizes = [1, 4], strides = [1, 1]} : vector<2x4xf32> to vector<1x4xf32>
    %506 = vector.broadcast %505 : vector<1x4xf32> to vector<8x4xf32>
    %507 = arith.mulf %506, %490 : vector<8x4xf32>
    %cst_18 = arith.constant dense<0.000000e+00> : vector<8xf32>
    %508 = vector.multi_reduction <add>, %507, %cst_18 [1] : vector<8x4xf32> to vector<8xf32>
    %509 = vector.shape_cast %508 : vector<8xf32> to vector<8x1xf32>
    %510 = vector.extract_strided_slice %491 {offsets = [1, 0], sizes = [1, 128], strides = [1, 1]} : vector<8x128xf32> to vector<1x128xf32>
    %511 = vector.broadcast %509 : vector<8x1xf32> to vector<8x128xf32>
    %512 = vector.broadcast %510 : vector<1x128xf32> to vector<8x128xf32>
    %513 = arith.mulf %511, %512 : vector<8x128xf32>
    %514 = arith.addf %504, %513 : vector<8x128xf32>
    %cst_19 = arith.constant 0.000000e+00 : f32
    %515 = vector.broadcast %cst_19 : f32 to vector<8x128xf32>
    %516 = arith.maximumf %514, %515 : vector<8x128xf32>
    %c56 = arith.constant 56 : index
    %c0_20 = arith.constant 0 : index
    %517 = vector.load %arg1[%c56, %c0_20] : memref<192x128xf32, #tpu.memory_space<vmem>>, vector<128x128xf32>
    %c184 = arith.constant 184 : index
    %c0_21 = arith.constant 0 : index
    %518 = vector.load %arg1[%c184, %c0_21] : memref<192x128xf32, #tpu.memory_space<vmem>>, vector<8x128xf32>
    %cst_22 = arith.constant dense<0.000000e+00> : vector<8x128xf32>
    %519 = tpu.matmul %516, %517, %cst_22 {dimension_numbers = #tpu.dot_dimension_numbers<[1], [0], [0], [1], [0, 0, 1, 1], [], []>} : vector<8x128xf32>, vector<128x128xf32>, vector<8x128xf32> -> vector<8x128xf32>
    %520 = vector.extract_strided_slice %518 {offsets = [0, 0], sizes = [1, 128], strides = [1, 1]} : vector<8x128xf32> to vector<1x128xf32>
    %521 = vector.broadcast %520 : vector<1x128xf32> to vector<8x128xf32>
    %522 = arith.addf %519, %521 : vector<8x128xf32>
    %c0_23 = arith.constant 0 : index
    %c0_24 = arith.constant 0 : index
    %523 = vector.load %arg2[%c0_23, %c0_24] : memref<8x128xf32, #tpu.memory_space<vmem>>, vector<8x128xf32>
    tpu.vector_store %arg2[%c0_23, %c0_24], %522 {strides = array<i32>} : memref<8x128xf32, #tpu.memory_space<vmem>>, vector<8x128xf32>,
    return
  }
}

</mosaic_0001>

<bundles_post_ra>
// kernel: tpu_custom_call.1
= control target key start
LH: loop header
LB: loop body
LE: loop exit
PB: predicated region body
PF: predicated region fallthrough
CT: control target
= control target key end

     0   :  { %7 = vsyncpa [#allocation3], 0  ;;  %s1510_s0 = inlined_call_operand.hbm [shape: f32[4,16], index: 0, kind: input, shape index: {}]   ;;  %s1511_s1 = inlined_call_operand.hbm [shape: f32[192,128], index: 1, kind: input, shape index: {}]   ;;  %s1512_s2 = inlined_call_operand.hbm [shape: f32[8,128], index: 2, kind: output, shape index: {}]  }
   0x1   :  { %8 = vsyncpa [#allocation6], 0 }
   0x2   :  { %9 = vsyncpa [#allocation4], 0  ;;  %s1200_s9 = smov [#allocation2]   ;;  %s1201_s11 = smov [#allocation5]  }
   0x3   :  { %s16_s10 = sshll.u32 %s1200_s9, 4  ;;  %s25_s12 = sshll.u32 %s1201_s11, 4  ;;  %s17_s10 = int_to_ptr.vmem [resolvable:$true] %s16_s10  ;;  %s1231_s12 = int_to_ptr.vmem [resolvable:$true] %s25_s12 }
   0x4   :  { %s1128_s15 = scalar_lea.hbm %s1510_s0, 64 }
   0x5   :  { %p1129_p0 = scmp.ne.s32.totalorder %s1510_s0, %s1128_s15  ;;  %p1132_p1 = scmp.lt.u32.totalorder %s1128_s15, %s1510_s0 }
   0x7   :  { %p1134_p2 = pnand %p1132_p1, %p1129_p0 }
   0x9   :  { %1137 = shalt.err (!%p1134_p2)
}
   0xa   :  { %s1138_s20 = scalar_lea.vmem %s17_s10, 64  ;;  %p1143_p4 = scmp.lt.s32.totalorder %s17_s10, %s17_s10 }
   0xb   :  { %p1139_p3 = scmp.ne.s32.totalorder %s17_s10, %s1138_s20  ;;  %p1144_p5 = scmp.lt.s32.totalorder %s1138_s20, %s1138_s20 }
   0xd   :  { %p1145_p6 = por %p1144_p5, %p1143_p4 }
   0xf   :  { %p1146_p7 = pnand %p1145_p6, %p1139_p3 }
  0x11   :  { %1149 = shalt.err (!%p1146_p7)
}
  0x12   :  { %19 = dma.hbm_to_vmem [thread:$0]  %s1510_s0, 64, %s17_s10, [#allocation3]  }
  0x13   :  { %s1150_s25 = scalar_lea.hbm %s1511_s1, 3072 }
  0x14   :  { %p1151_p8 = scmp.ne.s32.totalorder %s1511_s1, %s1150_s25  ;;  %p1154_p9 = scmp.lt.u32.totalorder %s1150_s25, %s1511_s1 }
  0x16   :  { %p1156_p10 = pnand %p1154_p9, %p1151_p8 }
  0x18   :  { %1159 = shalt.err (!%p1156_p10)
}
  0x19   :  { %s1160_s30 = scalar_lea.vmem %s1231_s12, 3072  ;;  %p1165_p12 = scmp.lt.s32.totalorder %s1231_s12, %s1231_s12 }
  0x1a   :  { %p1161_p11 = scmp.ne.s32.totalorder %s1231_s12, %s1160_s30  ;;  %p1166_p13 = scmp.lt.s32.totalorder %s1160_s30, %s1160_s30 }
  0x1c   :  { %p1167_p0 = por %p1166_p13, %p1165_p12 }
  0x1e   :  { %p1168_p1 = pnand %p1167_p0, %p1161_p11 }
  0x20   :  { %1171 = shalt.err (!%p1168_p1)
}
  0x21   :  { %s1202_s0 = smov 128   ;;  %s1203_s3 = smov 8  }
  0x22   :  { %31 = dma.hbm_to_vmem [thread:$0]  %s1511_s1, 3072, %s1231_s12, [#allocation6], %s1202_s0, %s1202_s0, %s1203_s3  }
  0x23   :  { %1194 = dma.done.wait [#allocation3], 64  }
  0x24   :  { %1195 = vsyncadd [#allocation3], 4294967232 }
  0x25   :  { %1196 = dma.done.wait [#allocation6], 3072  }
  0x26   :  { %1197 = vsyncadd [#allocation6], 4294964224  ;;  %v1204_v0 = vmov 0   ;;  %v47_v1 = vld [vmem:[#allocation5 + $0x10] sm:$0xff]  ;;  %v45_v2 = vld [vmem:[#allocation5] sm:$0xff]  ;;  %v1205_v3 = vmov 2   ;;  %v38_v10 = vlaneseq }
  0x27   :  { %1056 = vset.pattern.permute.xlu1 %v1204_v0  ;;  %1054 = vset.pattern.permute.xlu0 %v1204_v0  ;;  %v1206_v4 = vmov 1   ;;  %v46_v5 = vld [vmem:[#allocation5 + $0x8] sm:$0xff]  ;;  %v1207_v6 = vmov 3   ;;  %v421_v8 = vld [vmem:[#allocation5 + $0x20] sm:$0xff]  ;;  %v420_v9 = vld [vmem:[#allocation5 + $0x18] sm:$0xff]  ;;  %v1208_v39 = vmov 0.5  }
  0x28   :  { %77 = vperm.xlu1 %1056, %v47_v1   ;;  %60 = vperm.xlu0 %1054, %v45_v2   ;;  %v422_v7 = vld [vmem:[#allocation5 + $0x28] sm:$0xff]  ;;  %v1263_v11 = vshrl.u32 %v38_v10, 7  ;;  %v57_v13 = vld [vmem:[#allocation2] sm:$0xf]  ;;  %s1209_s1 = smov 2   ;;  %s1210_s6 = smov 114  }
  0x29   :  { %s1212_s7 = smov 116   ;;  %vm810_vm3 = vcmask 15360   ;;  %vm828_vm5 = vcmask 31744   ;;  %vm1214_vm6 = vmmov 0   ;;  %s1215_s8 = smov [#allocation7]  }
  0x2a   :  { %v1266_v12 = vsub.s32 0, %v1263_v11  ;;  %v88_v15 = vsub.s32 1, %v1263_v11  ;;  %v94_v18 = vsub.s32 2, %v1263_v11  ;;  %v100_v21 = vsub.s32 3, %v1263_v11  ;;  %s951_s9 = sshll.u32 %s1215_s8, 4  ;;  %s952_s9 = int_to_ptr.vmem [resolvable:$true] %s951_s9 }
  0x2b   :  { %vm40_vm0 = vcmp.ge.s32.totalorder %v1263_v11, 4  ;;  %vm41_vm1 = vcmp.lt.s32.totalorder %v1263_v11, 6  ;;  %v1297_v54 = vsub.s32 6, %v1263_v11  ;;  %v1300_v55 = vsub.s32 7, %v1263_v11  ;;  %s1172_s10 = scalar_lea.vmem %s952_s9, 128  ;;  %p1177_p3 = scmp.lt.s32.totalorder %s952_s9, %s952_s9 }
  0x2c   :  { %1057 = vset.pattern.permute.xlu1 %v1205_v3  ;;  %1055 = vset.pattern.permute.xlu0 %v1206_v4  ;;  %v83_v14 = vrot.slane %v57_v13, %v1266_v12  ;;  %v89_v20 = vrot.slane %v57_v13, %v88_v15  ;;  %v95_v22 = vrot.slane %v57_v13, %v94_v18  ;;  %vm42_vm2 = vmand %vm40_vm0, %vm41_vm1  ;;  %p1173_p2 = scmp.ne.s32.totalorder %s952_s9, %s1172_s10  ;;  %p1178_p4 = scmp.lt.s32.totalorder %s1172_s10, %s1172_s10 }
  0x2d   :  { %68 = vperm.xlu1 %1057, %v45_v2   ;;  %64 = vperm.xlu0 %1055, %v45_v2   ;;  %v101_v27 = vrot.slane %v57_v13, %v100_v21  ;;  %v1287_v40 = vsel %vm42_vm2, 1.0, %v1208_v39  ;;  %v1290_v44 = vsel %vm42_vm2, 0.0, %v1208_v39 }
  0x2e   :  { %p1179_p5 = por %p1178_p4, %p1177_p3 }
  0x30   :  { %p1180_p6 = pnand %p1179_p5, %p1173_p2 }
  0x31   :  { %1058 = vset.pattern.permute.xlu1 %v1207_v6  ;;  %1059 = vset.pattern.permute.xlu0 %v1204_v0 }
  0x32   :  { %72 = vperm.xlu1 %1058, %v45_v2   ;;  %50 = vperm.xlu0 %1059, %v46_v5  }
  0x36   :  { %1060 = vset.pattern.permute.xlu1 %v1206_v4  ;;  %434 = vperm.xlu0 %1059, %v422_v7  }
  0x37   :  { %54 = vperm.xlu1 %1060, %v46_v5  }
  0x3a   :  { %425 = vperm.xlu0 %1059, %v421_v8  }
  0x3b   :  { %1061 = vset.pattern.permute.xlu1 %v1204_v0 }
  0x3c   :  { %439 = vperm.xlu1 %1061, %v420_v9  }
  0x3e   :  { %1063 = vset.pattern.permute.xlu0 %v1206_v4 }
  0x40   :  { %1062 = vset.pattern.permute.xlu1 %v1206_v4 }
  0x41   :  { %443 = vperm.xlu1 %1062, %v420_v9  }
  0x45   :  { %429 = vperm.xlu1 %1062, %v421_v8  }
  0xa7   :  { %v78_v16 = vpop.permute.xlu1 %77  ;;  %v61_v17 = vpop.permute.xlu0 %60 }
  0xa8   :  { %v84_v19 = vmul.f32 %v83_v14, %v61_v17 }
  0xaa   :  { %v85_v25 = vadd.f32 %v84_v19, %v78_v16 }
  0xac   :  { %v69_v23 = vpop.permute.xlu1 %68  ;;  %v65_v24 = vpop.permute.xlu0 %64 }
  0xad   :  { %v90_v26 = vmul.f32 %v89_v20, %v65_v24  ;;  %v96_v28 = vmul.f32 %v95_v22, %v69_v23 }
  0xaf   :  { %v91_v29 = vadd.f32 %v90_v26, %v85_v25 }
  0xb1   :  { %v73_v30 = vpop.permute.xlu1 %72  ;;  %v97_v31 = vadd.f32 %v96_v28, %v91_v29  ;;  %v1276_v32 = vpop.permute.xlu0 %50 }
  0xb2   :  { %v102_v33 = vmul.f32 %v101_v27, %v73_v30  ;;  %v104_v34 = vmul.f32 0.0, %v1276_v32 }
  0xb4   :  { %v1281_v35 = vadd.f32 %v102_v33, %v97_v31 }
  0xb5   :  { %v1302_v57 = vpop.permute.xlu0 %434 }
  0xb6   :  { %v105_v36 = vadd.f32 %v104_v34, %v1281_v35  ;;  %v1284_v37 = vpop.permute.xlu1 %54 }
  0xb7   :  { %v106_v38 = vmul.f32 0.0, %v1284_v37 }
  0xb9   :  { %v107_v41 = vadd.f32 %v106_v38, %v105_v36  ;;  %v1311_v1 = vpop.permute.xlu0 %425 }
  0xba   :  { %v486_v6 = vmul.f32 0.0, %v1311_v1 }
  0xbb   :  { %v108_v42 = vmul.f32 %v107_v41, %v1287_v40  ;;  %v1294_v52 = vpop.permute.xlu1 %439 }
  0xbd   :  { %1064 = vtanh.f32 %v108_v42 }
  0xc0   :  { %v1304_v59 = vpop.permute.xlu1 %443 }
  0xc4   :  { %v1317_v4 = vpop.permute.xlu1 %429 }
  0xc5   :  { %v488_v7 = vmul.f32 0.0, %v1317_v4 }
  0xc7   :  { %v1065_v43 = vpop.eup %1064 }
  0xc8   :  { %v110_v45 = vmul.f32 %v1065_v43, %v1287_v40 }
  0xca   :  { %v111_v46 = vadd.f32 %v110_v45, %v1290_v44 }
  0xcc   :  { %v114_v47 = vrot.slane %v111_v46, 4  ;;  %v112_v49 = vmul.f32 0.0, %v111_v46 }
  0xce   :  { %v116_v48 = vmul.f32 %v114_v47, %v111_v46 }
  0xd0   :  { %v118_v50 = vrot.slane %v116_v48, 6 }
  0xd2   :  { %v120_v51 = vadd.f32 %v118_v50, %v112_v49 }
  0xd4   :  { %1066 = vtanh.f32 %v120_v51 }
  0xde   :  { %v1067_v53 = vpop.eup %1066 }
  0xdf   :  { %v123_v56 = vrot.slane %v1067_v53, 4 }
  0xe1   :  { %v125_v58 = vmul.f32 %v123_v56, %v111_v46 }
  0xe3   :  { %v139_v60 = vrot.slane %v125_v58, %v1300_v55  ;;  %v129_v61 = vrot.slane %v125_v58, %v1297_v54 }
  0xe5   :  { %v140_v62 = vmul.f32 %v139_v60, %v1284_v37  ;;  %v130_v63 = vmul.f32 %v129_v61, %v1276_v32  ;;  %v446_v0 = vmul.f32 %v1294_v52, %v129_v61  ;;  %v448_v2 = vmul.f32 %v1304_v59, %v139_v60 }
  0xe7   :  { %142 = vrot.lane.b32.xlu1 %v140_v62, %s1209_s1  ;;  %132 = vrot.lane.b32.xlu0 %v130_v63, %s1209_s1  ;;  %v447_v3 = vadd.f32 %v446_v0, %v1302_v57 }
  0xe9   :  { %v449_v5 = vadd.f32 %v448_v2, %v447_v3 }
  0xeb   :  { %v487_v8 = vadd.f32 %v486_v6, %v449_v5  ;;  %151 = vrot.lane.b32.xlu0 %v120_v51, %s1209_s1 }
  0xed   :  { %v489_v9 = vadd.f32 %v488_v7, %v487_v8 }
  0xef   :  { %v490_v13 = vmul.f32 %v489_v9, %v1287_v40 }
  0xf1   :  { %1068 = vtanh.f32 %v490_v13 }
  0xfb   :  { %v1069_v14 = vpop.eup %1068 }
  0xfc   :  { %v492_v16 = vmul.f32 %v1069_v14, %v1287_v40 }
  0xfe   :  { %v493_v17 = vadd.f32 %v492_v16, %v1290_v44 }
 0x100   :  { %v496_v19 = vrot.slane %v493_v17, 4  ;;  %v494_v21 = vmul.f32 0.0, %v493_v17 }
 0x102   :  { %v498_v20 = vmul.f32 %v496_v19, %v493_v17 }
 0x104   :  { %v500_v22 = vrot.slane %v498_v20, 6 }
 0x106   :  { %v502_v23 = vadd.f32 %v500_v22, %v494_v21 }
 0x108   :  { %1070 = vtanh.f32 %v502_v23 }
 0x112   :  { %v1071_v24 = vpop.eup %1070 }
 0x113   :  { %v505_v25 = vrot.slane %v1071_v24, 4 }
 0x115   :  { %v507_v26 = vmul.f32 %v505_v25, %v493_v17 }
 0x117   :  { %v521_v27 = vrot.slane %v507_v26, %v1300_v55  ;;  %v511_v28 = vrot.slane %v507_v26, %v1297_v54 }
 0x119   :  { %v522_v29 = vmul.f32 %v521_v27, %v1317_v4  ;;  %v512_v30 = vmul.f32 %v511_v28, %v1311_v1 }
 0x11b   :  { %524 = vrot.lane.b32.xlu0 %v522_v29, %s1209_s1  ;;  %514 = vrot.lane.b32.xlu1 %v512_v30, %s1209_s1 }
 0x11f   :  { %533 = vrot.lane.b32.xlu1 %v502_v23, %s1209_s1 }
 0x159   :  { %v133_v31 = vpop.permute.xlu0 %132  ;;  %v143_v34 = vpop.permute.xlu1 %142 }
 0x15a   :  { %v135_v33 = vadd.f32 %v133_v31, %v1281_v35 }
 0x15c   :  { %v145_v36 = vadd.f32 %v143_v34, %v135_v33 }
 0x15d   :  { %v152_v46 = vpop.permute.xlu0 %151 }
 0x15e   :  { %v146_v38 = vmul.f32 %v145_v36, %v1287_v40 }
 0x160   :  { %1072 = vtanh.f32 %v146_v38 }
 0x16a   :  { %v1073_v39 = vpop.eup %1072 }
 0x16b   :  { %v148_v41 = vmul.f32 %v1073_v39, %v1287_v40 }
 0x16d   :  { %v149_v42 = vadd.f32 %v148_v41, %v1290_v44 }
 0x16f   :  { %v156_v43 = vrot.slane %v149_v42, 4  ;;  %v154_v48 = vmul.f32 %v152_v46, %v149_v42 }
 0x171   :  { %v158_v45 = vmul.f32 %v156_v43, %v149_v42 }
 0x173   :  { %v160_v47 = vrot.slane %v158_v45, 6 }
 0x175   :  { %v162_v49 = vadd.f32 %v160_v47, %v154_v48 }
 0x177   :  { %1074 = vtanh.f32 %v162_v49 }
 0x181   :  { %v1075_v50 = vpop.eup %1074 }
 0x182   :  { %v165_v51 = vrot.slane %v1075_v50, 4 }
 0x184   :  { %v167_v53 = vmul.f32 %v165_v51, %v149_v42 }
 0x186   :  { %v181_v56 = vrot.slane %v167_v53, %v1300_v55  ;;  %v171_v58 = vrot.slane %v167_v53, %v1297_v54 }
 0x188   :  { %v182_v60 = vmul.f32 %v181_v56, %v1284_v37  ;;  %v172_v61 = vmul.f32 %v171_v58, %v1276_v32  ;;  %v450_v62 = vmul.f32 %v1294_v52, %v171_v58  ;;  %v452_v0 = vmul.f32 %v1304_v59, %v181_v56 }
 0x18a   :  { %184 = vrot.lane.b32.xlu1 %v182_v60, %s1209_s1  ;;  %174 = vrot.lane.b32.xlu0 %v172_v61, %s1209_s1  ;;  %v451_v63 = vadd.f32 %v450_v62, %v1302_v57 }
 0x18c   :  { %v453_v2 = vadd.f32 %v452_v0, %v451_v63 }
 0x18d   :  { %v515_v3 = vpop.permute.xlu1 %514  ;;  %v525_v6 = vpop.permute.xlu0 %524 }
 0x18e   :  { %v517_v5 = vadd.f32 %v515_v3, %v453_v2  ;;  %193 = vrot.lane.b32.xlu0 %v162_v49, %s1209_s1 }
 0x190   :  { %v527_v7 = vadd.f32 %v525_v6, %v517_v5 }
 0x191   :  { %v534_v19 = vpop.permute.xlu1 %533 }
 0x192   :  { %v528_v8 = vmul.f32 %v527_v7, %v1287_v40 }
 0x194   :  { %1076 = vtanh.f32 %v528_v8 }
 0x19e   :  { %v1077_v9 = vpop.eup %1076 }
 0x19f   :  { %v530_v13 = vmul.f32 %v1077_v9, %v1287_v40 }
 0x1a1   :  { %v531_v14 = vadd.f32 %v530_v13, %v1290_v44 }
 0x1a3   :  { %v538_v16 = vrot.slane %v531_v14, 4  ;;  %v536_v20 = vmul.f32 %v534_v19, %v531_v14 }
 0x1a5   :  { %v540_v17 = vmul.f32 %v538_v16, %v531_v14 }
 0x1a7   :  { %v542_v21 = vrot.slane %v540_v17, 6 }
 0x1a9   :  { %v544_v22 = vadd.f32 %v542_v21, %v536_v20 }
 0x1ab   :  { %1078 = vtanh.f32 %v544_v22 }
 0x1b5   :  { %v1079_v23 = vpop.eup %1078 }
 0x1b6   :  { %v547_v24 = vrot.slane %v1079_v23, 4 }
 0x1b8   :  { %v549_v25 = vmul.f32 %v547_v24, %v531_v14 }
 0x1ba   :  { %v563_v26 = vrot.slane %v549_v25, %v1300_v55  ;;  %v553_v27 = vrot.slane %v549_v25, %v1297_v54 }
 0x1bc   :  { %v564_v28 = vmul.f32 %v563_v26, %v1317_v4  ;;  %v554_v29 = vmul.f32 %v553_v27, %v1311_v1 }
 0x1be   :  { %566 = vrot.lane.b32.xlu0 %v564_v28, %s1209_s1  ;;  %556 = vrot.lane.b32.xlu1 %v554_v29, %s1209_s1 }
 0x1c2   :  { %575 = vrot.lane.b32.xlu1 %v544_v22, %s1209_s1 }
 0x1fc   :  { %v175_v30 = vpop.permute.xlu0 %174  ;;  %v185_v33 = vpop.permute.xlu1 %184 }
 0x1fd   :  { %v177_v31 = vadd.f32 %v175_v30, %v1281_v35 }
 0x1ff   :  { %v187_v34 = vadd.f32 %v185_v33, %v177_v31 }
 0x200   :  { %v194_v45 = vpop.permute.xlu0 %193 }
 0x201   :  { %v188_v36 = vmul.f32 %v187_v34, %v1287_v40 }
 0x203   :  { %1080 = vtanh.f32 %v188_v36 }
 0x20d   :  { %v1081_v38 = vpop.eup %1080 }
 0x20e   :  { %v190_v39 = vmul.f32 %v1081_v38, %v1287_v40 }
 0x210   :  { %v191_v41 = vadd.f32 %v190_v39, %v1290_v44 }
 0x212   :  { %v198_v42 = vrot.slane %v191_v41, 4  ;;  %v196_v47 = vmul.f32 %v194_v45, %v191_v41 }
 0x214   :  { %v200_v43 = vmul.f32 %v198_v42, %v191_v41 }
 0x216   :  { %v202_v46 = vrot.slane %v200_v43, 6 }
 0x218   :  { %v204_v48 = vadd.f32 %v202_v46, %v196_v47 }
 0x21a   :  { %1082 = vtanh.f32 %v204_v48 }
 0x224   :  { %v1083_v49 = vpop.eup %1082 }
 0x225   :  { %v207_v50 = vrot.slane %v1083_v49, 4 }
 0x227   :  { %v209_v51 = vmul.f32 %v207_v50, %v191_v41 }
 0x229   :  { %v223_v53 = vrot.slane %v209_v51, %v1300_v55  ;;  %v213_v56 = vrot.slane %v209_v51, %v1297_v54 }
 0x22b   :  { %v224_v58 = vmul.f32 %v223_v53, %v1284_v37  ;;  %v214_v60 = vmul.f32 %v213_v56, %v1276_v32  ;;  %v454_v61 = vmul.f32 %v1294_v52, %v213_v56  ;;  %v456_v63 = vmul.f32 %v1304_v59, %v223_v53 }
 0x22d   :  { %226 = vrot.lane.b32.xlu1 %v224_v58, %s1209_s1  ;;  %216 = vrot.lane.b32.xlu0 %v214_v60, %s1209_s1  ;;  %v455_v62 = vadd.f32 %v454_v61, %v1302_v57 }
 0x22f   :  { %v457_v0 = vadd.f32 %v456_v63, %v455_v62 }
 0x230   :  { %v557_v2 = vpop.permute.xlu1 %556  ;;  %v567_v5 = vpop.permute.xlu0 %566 }
 0x231   :  { %v559_v3 = vadd.f32 %v557_v2, %v457_v0  ;;  %235 = vrot.lane.b32.xlu0 %v204_v48, %s1209_s1 }
 0x233   :  { %v569_v6 = vadd.f32 %v567_v5, %v559_v3 }
 0x234   :  { %v576_v17 = vpop.permute.xlu1 %575 }
 0x235   :  { %v570_v7 = vmul.f32 %v569_v6, %v1287_v40 }
 0x237   :  { %1084 = vtanh.f32 %v570_v7 }
 0x241   :  { %v1085_v8 = vpop.eup %1084 }
 0x242   :  { %v572_v9 = vmul.f32 %v1085_v8, %v1287_v40 }
 0x244   :  { %v573_v13 = vadd.f32 %v572_v9, %v1290_v44 }
 0x246   :  { %v580_v14 = vrot.slane %v573_v13, 4  ;;  %v578_v19 = vmul.f32 %v576_v17, %v573_v13 }
 0x248   :  { %v582_v16 = vmul.f32 %v580_v14, %v573_v13 }
 0x24a   :  { %v584_v20 = vrot.slane %v582_v16, 6 }
 0x24c   :  { %v586_v21 = vadd.f32 %v584_v20, %v578_v19 }
 0x24e   :  { %1086 = vtanh.f32 %v586_v21 }
 0x258   :  { %v1087_v22 = vpop.eup %1086 }
 0x259   :  { %v589_v23 = vrot.slane %v1087_v22, 4 }
 0x25b   :  { %v591_v24 = vmul.f32 %v589_v23, %v573_v13 }
 0x25d   :  { %v605_v25 = vrot.slane %v591_v24, %v1300_v55  ;;  %v595_v26 = vrot.slane %v591_v24, %v1297_v54 }
 0x25f   :  { %v606_v27 = vmul.f32 %v605_v25, %v1317_v4  ;;  %v596_v28 = vmul.f32 %v595_v26, %v1311_v1 }
 0x261   :  { %608 = vrot.lane.b32.xlu0 %v606_v27, %s1209_s1  ;;  %598 = vrot.lane.b32.xlu1 %v596_v28, %s1209_s1 }
 0x265   :  { %617 = vrot.lane.b32.xlu1 %v586_v21, %s1209_s1 }
 0x29f   :  { %v217_v29 = vpop.permute.xlu0 %216  ;;  %v227_v31 = vpop.permute.xlu1 %226 }
 0x2a0   :  { %v219_v30 = vadd.f32 %v217_v29, %v1281_v35 }
 0x2a2   :  { %v229_v33 = vadd.f32 %v227_v31, %v219_v30 }
 0x2a3   :  { %v236_v43 = vpop.permute.xlu0 %235 }
 0x2a4   :  { %v230_v34 = vmul.f32 %v229_v33, %v1287_v40 }
 0x2a6   :  { %1088 = vtanh.f32 %v230_v34 }
 0x2b0   :  { %v1089_v36 = vpop.eup %1088 }
 0x2b1   :  { %v232_v38 = vmul.f32 %v1089_v36, %v1287_v40 }
 0x2b3   :  { %v233_v39 = vadd.f32 %v232_v38, %v1290_v44 }
 0x2b5   :  { %v240_v41 = vrot.slane %v233_v39, 4  ;;  %v238_v46 = vmul.f32 %v236_v43, %v233_v39 }
 0x2b7   :  { %v242_v42 = vmul.f32 %v240_v41, %v233_v39 }
 0x2b9   :  { %v244_v45 = vrot.slane %v242_v42, 6 }
 0x2bb   :  { %v246_v47 = vadd.f32 %v244_v45, %v238_v46 }
 0x2bd   :  { %1090 = vtanh.f32 %v246_v47 }
 0x2c7   :  { %v1091_v48 = vpop.eup %1090 }
 0x2c8   :  { %v249_v49 = vrot.slane %v1091_v48, 4 }
 0x2ca   :  { %v251_v50 = vmul.f32 %v249_v49, %v233_v39 }
 0x2cc   :  { %v265_v51 = vrot.slane %v251_v50, %v1300_v55  ;;  %v255_v53 = vrot.slane %v251_v50, %v1297_v54 }
 0x2ce   :  { %v266_v56 = vmul.f32 %v265_v51, %v1284_v37  ;;  %v256_v58 = vmul.f32 %v255_v53, %v1276_v32  ;;  %v458_v60 = vmul.f32 %v1294_v52, %v255_v53  ;;  %v460_v62 = vmul.f32 %v1304_v59, %v265_v51 }
 0x2d0   :  { %268 = vrot.lane.b32.xlu1 %v266_v56, %s1209_s1  ;;  %258 = vrot.lane.b32.xlu0 %v256_v58, %s1209_s1  ;;  %v459_v61 = vadd.f32 %v458_v60, %v1302_v57 }
 0x2d2   :  { %v461_v63 = vadd.f32 %v460_v62, %v459_v61 }
 0x2d3   :  { %v599_v0 = vpop.permute.xlu1 %598  ;;  %v609_v3 = vpop.permute.xlu0 %608 }
 0x2d4   :  { %v601_v2 = vadd.f32 %v599_v0, %v461_v63  ;;  %277 = vrot.lane.b32.xlu0 %v246_v47, %s1209_s1 }
 0x2d6   :  { %v611_v5 = vadd.f32 %v609_v3, %v601_v2 }
 0x2d7   :  { %v618_v16 = vpop.permute.xlu1 %617 }
 0x2d8   :  { %v612_v6 = vmul.f32 %v611_v5, %v1287_v40 }
 0x2da   :  { %1092 = vtanh.f32 %v612_v6 }
 0x2e4   :  { %v1093_v7 = vpop.eup %1092 }
 0x2e5   :  { %v614_v8 = vmul.f32 %v1093_v7, %v1287_v40 }
 0x2e7   :  { %v615_v9 = vadd.f32 %v614_v8, %v1290_v44 }
 0x2e9   :  { %v622_v13 = vrot.slane %v615_v9, 4  ;;  %v620_v17 = vmul.f32 %v618_v16, %v615_v9 }
 0x2eb   :  { %v624_v14 = vmul.f32 %v622_v13, %v615_v9 }
 0x2ed   :  { %v626_v19 = vrot.slane %v624_v14, 6 }
 0x2ef   :  { %v628_v20 = vadd.f32 %v626_v19, %v620_v17 }
 0x2f1   :  { %1094 = vtanh.f32 %v628_v20 }
 0x2fb   :  { %v1095_v21 = vpop.eup %1094 }
 0x2fc   :  { %v631_v22 = vrot.slane %v1095_v21, 4 }
 0x2fe   :  { %v633_v23 = vmul.f32 %v631_v22, %v615_v9 }
 0x300   :  { %v647_v24 = vrot.slane %v633_v23, %v1300_v55  ;;  %v637_v25 = vrot.slane %v633_v23, %v1297_v54 }
 0x302   :  { %v648_v26 = vmul.f32 %v647_v24, %v1317_v4  ;;  %v638_v27 = vmul.f32 %v637_v25, %v1311_v1 }
 0x304   :  { %650 = vrot.lane.b32.xlu0 %v648_v26, %s1209_s1  ;;  %640 = vrot.lane.b32.xlu1 %v638_v27, %s1209_s1 }
 0x308   :  { %659 = vrot.lane.b32.xlu1 %v628_v20, %s1209_s1 }
 0x342   :  { %v259_v28 = vpop.permute.xlu0 %258  ;;  %v269_v30 = vpop.permute.xlu1 %268 }
 0x343   :  { %v261_v29 = vadd.f32 %v259_v28, %v1281_v35 }
 0x345   :  { %v271_v31 = vadd.f32 %v269_v30, %v261_v29 }
 0x346   :  { %v278_v42 = vpop.permute.xlu0 %277 }
 0x347   :  { %v272_v33 = vmul.f32 %v271_v31, %v1287_v40 }
 0x349   :  { %1096 = vtanh.f32 %v272_v33 }
 0x353   :  { %v1097_v34 = vpop.eup %1096 }
 0x354   :  { %v274_v36 = vmul.f32 %v1097_v34, %v1287_v40 }
 0x356   :  { %v275_v38 = vadd.f32 %v274_v36, %v1290_v44 }
 0x358   :  { %v282_v39 = vrot.slane %v275_v38, 4  ;;  %v280_v45 = vmul.f32 %v278_v42, %v275_v38 }
 0x35a   :  { %v284_v41 = vmul.f32 %v282_v39, %v275_v38 }
 0x35c   :  { %v286_v43 = vrot.slane %v284_v41, 6 }
 0x35e   :  { %v288_v46 = vadd.f32 %v286_v43, %v280_v45 }
 0x360   :  { %1098 = vtanh.f32 %v288_v46 }
 0x36a   :  { %v1099_v47 = vpop.eup %1098 }
 0x36b   :  { %v291_v48 = vrot.slane %v1099_v47, 4 }
 0x36d   :  { %v293_v49 = vmul.f32 %v291_v48, %v275_v38 }
 0x36f   :  { %v307_v50 = vrot.slane %v293_v49, %v1300_v55  ;;  %v297_v51 = vrot.slane %v293_v49, %v1297_v54 }
 0x371   :  { %v308_v53 = vmul.f32 %v307_v50, %v1284_v37  ;;  %v298_v56 = vmul.f32 %v297_v51, %v1276_v32  ;;  %v462_v58 = vmul.f32 %v1294_v52, %v297_v51  ;;  %v464_v61 = vmul.f32 %v1304_v59, %v307_v50 }
 0x373   :  { %310 = vrot.lane.b32.xlu1 %v308_v53, %s1209_s1  ;;  %300 = vrot.lane.b32.xlu0 %v298_v56, %s1209_s1  ;;  %v463_v60 = vadd.f32 %v462_v58, %v1302_v57 }
 0x375   :  { %v465_v62 = vadd.f32 %v464_v61, %v463_v60 }
 0x376   :  { %v641_v63 = vpop.permute.xlu1 %640  ;;  %v651_v2 = vpop.permute.xlu0 %650 }
 0x377   :  { %v643_v0 = vadd.f32 %v641_v63, %v465_v62  ;;  %319 = vrot.lane.b32.xlu0 %v288_v46, %s1209_s1 }
 0x379   :  { %v653_v3 = vadd.f32 %v651_v2, %v643_v0 }
 0x37a   :  { %v660_v14 = vpop.permute.xlu1 %659 }
 0x37b   :  { %v654_v5 = vmul.f32 %v653_v3, %v1287_v40 }
 0x37d   :  { %1100 = vtanh.f32 %v654_v5 }
 0x387   :  { %v1101_v6 = vpop.eup %1100 }
 0x388   :  { %v656_v7 = vmul.f32 %v1101_v6, %v1287_v40 }
 0x38a   :  { %v657_v8 = vadd.f32 %v656_v7, %v1290_v44 }
 0x38c   :  { %v664_v9 = vrot.slane %v657_v8, 4  ;;  %v662_v16 = vmul.f32 %v660_v14, %v657_v8 }
 0x38e   :  { %v666_v13 = vmul.f32 %v664_v9, %v657_v8 }
 0x390   :  { %v668_v17 = vrot.slane %v666_v13, 6 }
 0x392   :  { %v670_v19 = vadd.f32 %v668_v17, %v662_v16 }
 0x394   :  { %1102 = vtanh.f32 %v670_v19 }
 0x39e   :  { %v1103_v20 = vpop.eup %1102 }
 0x39f   :  { %v673_v21 = vrot.slane %v1103_v20, 4 }
 0x3a1   :  { %v675_v22 = vmul.f32 %v673_v21, %v657_v8 }
 0x3a3   :  { %v689_v23 = vrot.slane %v675_v22, %v1300_v55  ;;  %v679_v24 = vrot.slane %v675_v22, %v1297_v54 }
 0x3a5   :  { %v690_v25 = vmul.f32 %v689_v23, %v1317_v4  ;;  %v680_v26 = vmul.f32 %v679_v24, %v1311_v1 }
 0x3a7   :  { %692 = vrot.lane.b32.xlu0 %v690_v25, %s1209_s1  ;;  %682 = vrot.lane.b32.xlu1 %v680_v26, %s1209_s1 }
 0x3ab   :  { %701 = vrot.lane.b32.xlu1 %v670_v19, %s1209_s1 }
 0x3e5   :  { %v301_v27 = vpop.permute.xlu0 %300  ;;  %v311_v29 = vpop.permute.xlu1 %310 }
 0x3e6   :  { %v303_v28 = vadd.f32 %v301_v27, %v1281_v35 }
 0x3e8   :  { %v313_v30 = vadd.f32 %v311_v29, %v303_v28 }
 0x3e9   :  { %v320_v41 = vpop.permute.xlu0 %319 }
 0x3ea   :  { %v314_v31 = vmul.f32 %v313_v30, %v1287_v40 }
 0x3ec   :  { %1104 = vtanh.f32 %v314_v31 }
 0x3f6   :  { %v1105_v33 = vpop.eup %1104 }
 0x3f7   :  { %v316_v34 = vmul.f32 %v1105_v33, %v1287_v40 }
 0x3f9   :  { %v317_v36 = vadd.f32 %v316_v34, %v1290_v44 }
 0x3fb   :  { %v324_v38 = vrot.slane %v317_v36, 4  ;;  %v322_v43 = vmul.f32 %v320_v41, %v317_v36 }
 0x3fd   :  { %v326_v39 = vmul.f32 %v324_v38, %v317_v36 }
 0x3ff   :  { %v328_v42 = vrot.slane %v326_v39, 6 }
 0x401   :  { %v330_v45 = vadd.f32 %v328_v42, %v322_v43 }
 0x403   :  { %1106 = vtanh.f32 %v330_v45 }
 0x40d   :  { %v1107_v46 = vpop.eup %1106 }
 0x40e   :  { %v333_v47 = vrot.slane %v1107_v46, 4 }
 0x410   :  { %v335_v48 = vmul.f32 %v333_v47, %v317_v36 }
 0x412   :  { %v349_v49 = vrot.slane %v335_v48, %v1300_v55  ;;  %v339_v50 = vrot.slane %v335_v48, %v1297_v54 }
 0x414   :  { %v350_v51 = vmul.f32 %v349_v49, %v1284_v37  ;;  %v340_v53 = vmul.f32 %v339_v50, %v1276_v32  ;;  %v466_v56 = vmul.f32 %v1294_v52, %v339_v50  ;;  %v468_v60 = vmul.f32 %v1304_v59, %v349_v49 }
 0x416   :  { %352 = vrot.lane.b32.xlu1 %v350_v51, %s1209_s1  ;;  %342 = vrot.lane.b32.xlu0 %v340_v53, %s1209_s1  ;;  %v467_v58 = vadd.f32 %v466_v56, %v1302_v57 }
 0x418   :  { %v469_v61 = vadd.f32 %v468_v60, %v467_v58 }
 0x419   :  { %v683_v62 = vpop.permute.xlu1 %682  ;;  %v693_v0 = vpop.permute.xlu0 %692 }
 0x41a   :  { %v685_v63 = vadd.f32 %v683_v62, %v469_v61  ;;  %361 = vrot.lane.b32.xlu0 %v330_v45, %s1209_s1 }
 0x41c   :  { %v695_v2 = vadd.f32 %v693_v0, %v685_v63 }
 0x41d   :  { %v702_v13 = vpop.permute.xlu1 %701 }
 0x41e   :  { %v696_v3 = vmul.f32 %v695_v2, %v1287_v40 }
 0x420   :  { %1108 = vtanh.f32 %v696_v3 }
 0x42a   :  { %v1109_v5 = vpop.eup %1108 }
 0x42b   :  { %v698_v6 = vmul.f32 %v1109_v5, %v1287_v40 }
 0x42d   :  { %v699_v7 = vadd.f32 %v698_v6, %v1290_v44 }
 0x42f   :  { %v706_v8 = vrot.slane %v699_v7, 4  ;;  %v704_v14 = vmul.f32 %v702_v13, %v699_v7 }
 0x431   :  { %v708_v9 = vmul.f32 %v706_v8, %v699_v7 }
 0x433   :  { %v710_v16 = vrot.slane %v708_v9, 6 }
 0x435   :  { %v712_v17 = vadd.f32 %v710_v16, %v704_v14 }
 0x437   :  { %1110 = vtanh.f32 %v712_v17 }
 0x441   :  { %v1111_v19 = vpop.eup %1110 }
 0x442   :  { %v715_v20 = vrot.slane %v1111_v19, 4 }
 0x444   :  { %v717_v21 = vmul.f32 %v715_v20, %v699_v7 }
 0x446   :  { %v731_v22 = vrot.slane %v717_v21, %v1300_v55  ;;  %v721_v23 = vrot.slane %v717_v21, %v1297_v54 }
 0x448   :  { %v732_v24 = vmul.f32 %v731_v22, %v1317_v4  ;;  %v722_v25 = vmul.f32 %v721_v23, %v1311_v1 }
 0x44a   :  { %734 = vrot.lane.b32.xlu0 %v732_v24, %s1209_s1  ;;  %724 = vrot.lane.b32.xlu1 %v722_v25, %s1209_s1 }
 0x44e   :  { %743 = vrot.lane.b32.xlu1 %v712_v17, %s1209_s1 }
 0x488   :  { %v343_v26 = vpop.permute.xlu0 %342  ;;  %v353_v28 = vpop.permute.xlu1 %352 }
 0x489   :  { %v345_v27 = vadd.f32 %v343_v26, %v1281_v35 }
 0x48b   :  { %v355_v29 = vadd.f32 %v353_v28, %v345_v27 }
 0x48c   :  { %v362_v39 = vpop.permute.xlu0 %361 }
 0x48d   :  { %v356_v30 = vmul.f32 %v355_v29, %v1287_v40 }
 0x48f   :  { %1112 = vtanh.f32 %v356_v30 }
 0x499   :  { %v1113_v31 = vpop.eup %1112 }
 0x49a   :  { %v358_v33 = vmul.f32 %v1113_v31, %v1287_v40 }
 0x49c   :  { %v359_v34 = vadd.f32 %v358_v33, %v1290_v44 }
 0x49e   :  { %v366_v36 = vrot.slane %v359_v34, 4  ;;  %v364_v42 = vmul.f32 %v362_v39, %v359_v34 }
 0x4a0   :  { %v368_v38 = vmul.f32 %v366_v36, %v359_v34 }
 0x4a2   :  { %v370_v41 = vrot.slane %v368_v38, 6 }
 0x4a4   :  { %v372_v43 = vadd.f32 %v370_v41, %v364_v42 }
 0x4a6   :  { %1114 = vtanh.f32 %v372_v43 }
 0x4b0   :  { %v1115_v45 = vpop.eup %1114 }
 0x4b1   :  { %v375_v46 = vrot.slane %v1115_v45, 4 }
 0x4b3   :  { %v377_v47 = vmul.f32 %v375_v46, %v359_v34 }
 0x4b5   :  { %v391_v48 = vrot.slane %v377_v47, %v1300_v55  ;;  %v381_v49 = vrot.slane %v377_v47, %v1297_v54 }
 0x4b7   :  { %v392_v50 = vmul.f32 %v391_v48, %v1284_v37  ;;  %v382_v51 = vmul.f32 %v381_v49, %v1276_v32  ;;  %v470_v53 = vmul.f32 %v1294_v52, %v381_v49  ;;  %v472_v58 = vmul.f32 %v1304_v59, %v391_v48 }
 0x4b9   :  { %394 = vrot.lane.b32.xlu1 %v392_v50, %s1209_s1  ;;  %384 = vrot.lane.b32.xlu0 %v382_v51, %s1209_s1  ;;  %v471_v56 = vadd.f32 %v470_v53, %v1302_v57 }
 0x4bb   :  { %v473_v60 = vadd.f32 %v472_v58, %v471_v56 }
 0x4bc   :  { %v725_v61 = vpop.permute.xlu1 %724  ;;  %v735_v63 = vpop.permute.xlu0 %734 }
 0x4bd   :  { %v727_v62 = vadd.f32 %v725_v61, %v473_v60  ;;  %403 = vrot.lane.b32.xlu0 %v372_v43, %s1209_s1 }
 0x4bf   :  { %v737_v0 = vadd.f32 %v735_v63, %v727_v62 }
 0x4c0   :  { %v744_v7 = vpop.permute.xlu1 %743 }
 0x4c1   :  { %v738_v37 = vmul.f32 %v737_v0, %v1287_v40 }
 0x4c3   :  { %1116 = vtanh.f32 %v738_v37  ;;  %v853_v37 = vld [vmem:[#allocation5 + $0x38] sm:$0xff] }
 0x4cd   :  { %v1117_v32 = vpop.eup %1116 }
 0x4ce   :  { %v740_v2 = vmul.f32 %v1117_v32, %v1287_v40  ;;  %v854_v32 = vld [vmem:[#allocation5 + $0x40] sm:$0xff] }
 0x4d0   :  { %v741_v3 = vadd.f32 %v740_v2, %v1290_v44  ;;  %v855_v2 = vld [vmem:[#allocation5 + $0x48] sm:$0xff] }
 0x4d2   :  { %v748_v5 = vrot.slane %v741_v3, 4  ;;  %v746_v8 = vmul.f32 %v744_v7, %v741_v3  ;;  %v856_v7 = vld [vmem:[#allocation5 + $0x50] sm:$0xff] }
 0x4d4   :  { %v750_v6 = vmul.f32 %v748_v5, %v741_v3  ;;  %v1211_v5 = vmov 0.0|0.0  }
 0x4d5   :  { %1014 = vmatprep.subr.bf16.mxu0 %v1211_v5 }
 0x4d6   :  { %v752_v9 = vrot.slane %v750_v6, 6  ;;  %v1015_v6 = vpack.c.bf16 %v854_v32, %v853_v37 }
 0x4d8   :  { %v754_v13 = vadd.f32 %v752_v9, %v746_v8  ;;  %1016 = vmatpush3.bf16.msra.mxu0 %v1015_v6  ;;  %v858_v9 = vld [vmem:[#allocation5 + $0x60] sm:$0xff] }
 0x4d9   :  { %1017 = vmatprep.subr.bf16.mxu0 %v1211_v5 }
 0x4da   :  { %1118 = vtanh.f32 %v754_v13 }
 0x4e4   :  { %v1119_v14 = vpop.eup %1118 }
 0x4e5   :  { %v757_v16 = vrot.slane %v1119_v14, 4  ;;  %v859_v14 = vld [vmem:[#allocation5 + $0x68] sm:$0xff] }
 0x4e7   :  { %v759_v17 = vmul.f32 %v757_v16, %v741_v3  ;;  %v860_v16 = vld [vmem:[#allocation5 + $0x70] sm:$0xff] }
 0x4e9   :  { %v773_v19 = vrot.slane %v759_v17, %v1300_v55  ;;  %v763_v20 = vrot.slane %v759_v17, %v1297_v54  ;;  %v1024_v17 = vpack.c.bf16 %v860_v16, %v859_v14 }
 0x4eb   :  { %v774_v21 = vmul.f32 %v773_v19, %v1317_v4  ;;  %v764_v22 = vmul.f32 %v763_v20, %v1311_v1  ;;  %v861_v19 = vld [vmem:[#allocation5 + $0x78] sm:$0xff]  ;;  %v862_v20 = vld [vmem:[#allocation5 + $0x80] sm:$0xff] }
 0x4ed   :  { %776 = vrot.lane.b32.xlu0 %v774_v21, %s1209_s1  ;;  %766 = vrot.lane.b32.xlu1 %v764_v22, %s1209_s1  ;;  %v1027_v21 = vpack.c.bf16 %v862_v20, %v861_v19  ;;  %v863_v22 = vld [vmem:[#allocation5 + $0x88] sm:$0xff] }
 0x4f1   :  { %785 = vrot.lane.b32.xlu1 %v754_v13, %s1209_s1 }
 0x52b   :  { %v385_v23 = vpop.permute.xlu0 %384  ;;  %v395_v25 = vpop.permute.xlu1 %394 }
 0x52c   :  { %v387_v24 = vadd.f32 %v385_v23, %v1281_v35  ;;  %v864_v23 = vld [vmem:[#allocation5 + $0x90] sm:$0xff] }
 0x52e   :  { %v397_v26 = vadd.f32 %v395_v25, %v387_v24  ;;  %v1030_v24 = vpack.c.bf16 %v864_v23, %v863_v22  ;;  %v814_v25 = vand.u32 127, %v38_v10  ;;  %v865_v10 = vld [vmem:[#allocation5 + $0x98] sm:$0xff] }
 0x52f   :  { %v404_v31 = vpop.permute.xlu0 %403 }
 0x530   :  { %v398_v27 = vmul.f32 %v397_v26, %v1287_v40  ;;  %vm815_vm4 = vcmp.eq.s32.totalorder %v1263_v11, %v814_v25 }
 0x532   :  { %1120 = vtanh.f32 %v398_v27 }
 0x53c   :  { %v1121_v28 = vpop.eup %1120 }
 0x53d   :  { %v400_v29 = vmul.f32 %v1121_v28, %v1287_v40 }
 0x53f   :  { %v401_v4 = vadd.f32 %v400_v29, %v1290_v44 }
 0x541   :  { %v408_v1 = vrot.slane %v401_v4, 4  ;;  %v406_v34 = vmul.f32 %v404_v31, %v401_v4 }
 0x543   :  { %v410_v30 = vmul.f32 %v408_v1, %v401_v4 }
 0x545   :  { %v412_v33 = vrot.slane %v410_v30, 6 }
 0x547   :  { %v414_v36 = vadd.f32 %v412_v33, %v406_v34 }
 0x549   :  { %1122 = vtanh.f32 %v414_v36 }
 0x553   :  { %v1123_v38 = vpop.eup %1122 }
 0x554   :  { %v417_v39 = vrot.slane %v1123_v38, 4 }
 0x556   :  { %v419_v35 = vmul.f32 %v417_v39, %v401_v4  ;;  %v1213_v4 = vmov 0.0   ;;  %v866_v39 = vld [vmem:[#allocation5 + $0xa0] sm:$0xff] }
 0x557   :  { %v961_v1 = vsel %vm815_vm4, 1.0, %v1213_v4  ;;  %1011 = vmatprep.mubr.msk.f32.mxu0 %vm1214_vm6, %v1213_v4 }
 0x558   :  { %803 = vrot.lane.b32.xlu0 %v419_v35, %s1210_s6  ;;  %v477_v41 = vrot.slane %v419_v35, %v1297_v54  ;;  %v483_v42 = vrot.slane %v419_v35, %v1300_v55  ;;  %v1033_v35 = vpack.c.bf16 %v866_v39, %v865_v10 }
 0x55a   :  { %v478_v43 = vmul.f32 %v477_v41, %v1294_v52  ;;  %v484_v46 = vmul.f32 %v483_v42, %v1304_v59  ;;  %v867_v41 = vld [vmem:[#allocation5 + $0xa8] sm:$0xff]  ;;  %v868_v42 = vld [vmem:[#allocation5 + $0xb0] sm:$0xff] }
 0x55c   :  { %v479_v45 = vadd.f32 %v478_v43, %v1302_v57  ;;  %v1036_v43 = vpack.c.bf16 %v868_v42, %v867_v41 }
 0x55e   :  { %v485_v47 = vadd.f32 %v484_v46, %v479_v45 }
 0x55f   :  { %v767_v48 = vpop.permute.xlu1 %766  ;;  %v777_v50 = vpop.permute.xlu0 %776 }
 0x560   :  { %v769_v49 = vadd.f32 %v767_v48, %v485_v47 }
 0x562   :  { %v779_v51 = vadd.f32 %v777_v50, %v769_v49 }
 0x563   :  { %v786_v52 = vpop.permute.xlu1 %785 }
 0x564   :  { %v780_v53 = vmul.f32 %v779_v51, %v1287_v40 }
 0x566   :  { %1124 = vtanh.f32 %v780_v53 }
 0x570   :  { %v1125_v56 = vpop.eup %1124 }
 0x571   :  { %v782_v58 = vmul.f32 %v1125_v56, %v1287_v40  ;;  %v1018_v40 = vpack.c.bf16 %v856_v7, %v855_v2 }
 0x573   :  { %v783_v60 = vadd.f32 %v782_v58, %v1290_v44  ;;  %v857_v44 = vld [vmem:[#allocation5 + $0x58] sm:$0xff]  ;;  %1019 = vmatpush3.bf16.msra.mxu0 %v1018_v40 }
 0x574   :  { %v1021_v13 = vpack.c.bf16 %v858_v9, %v857_v44  ;;  %1020 = vmatprep.subr.bf16.mxu0 %v1211_v5  ;;  %v869_v58 = vld [vmem:[#allocation5 + $0xb8] sm:$0xff] }
 0x575   :  { %v790_v61 = vrot.slane %v783_v60, 4  ;;  %v788_v63 = vmul.f32 %v786_v52, %v783_v60 }
 0x577   :  { %v792_v62 = vmul.f32 %v790_v61, %v783_v60  ;;  %1022 = vmatpush3.bf16.msra.mxu0 %v1021_v13 }
 0x578   :  { %1023 = vmatprep.subr.bf16.mxu0 %v1211_v5 }
 0x579   :  { %v794_v57 = vrot.slane %v792_v62, 6 }
 0x57b   :  { %v796_v0 = vadd.f32 %v794_v57, %v788_v63  ;;  %1025 = vmatpush3.bf16.msra.mxu0 %v1024_v17 }
 0x57c   :  { %1026 = vmatprep.subr.bf16.mxu0 %v1211_v5 }
 0x57d   :  { %1126 = vtanh.f32 %v796_v0 }
 0x57f   :  { %1028 = vmatpush3.bf16.msra.mxu0 %v1027_v21 }
 0x580   :  { %1029 = vmatprep.subr.bf16.mxu0 %v1211_v5 }
 0x583   :  { %1031 = vmatpush3.bf16.msra.mxu0 %v1030_v24 }
 0x584   :  { %1032 = vmatprep.subr.bf16.mxu0 %v1211_v5 }
 0x587   :  { %v1127_v59 = vpop.eup %1126  ;;  %1034 = vmatpush3.bf16.msra.mxu0 %v1033_v35 }
 0x588   :  { %v799_v3 = vrot.slane %v1127_v59, 4  ;;  %1035 = vmatprep.subr.bf16.mxu0 %v1211_v5 }
 0x58a   :  { %v801_v8 = vmul.f32 %v799_v3, %v783_v60  ;;  %v873_v60 = vrot.slane %v869_v58, %v1266_v12 }
 0x58b   :  { %1037 = vmatpush3.bf16.msra.mxu0 %v1036_v43 }
 0x58c   :  { %807 = vrot.lane.b32.xlu1 %v801_v8, %s1212_s7 }
 0x5ca   :  { %v804_v26 = vpop.permute.xlu0 %803 }
 0x5fe   :  { %v808_v27 = vpop.permute.xlu1 %807 }
 0x5ff   :  { %v811_v28 = vsel %vm810_vm3, %v804_v26, %v808_v27 }
 0x600   :  { %v812_v29 = vmax.f32 %v811_v28, 0.0 }
 0x602   :  { %v826_v30 = vrot.slane %v812_v29, %v1297_v54  ;;  %v841_v31 = vrot.slane %v812_v29, %v1300_v55  ;;  %v818_v54 = vld [vmem:[#allocation5 + $0x30] sm:$0xff] }
 0x603   :  { %v835_v55 = vrot.slane %v818_v54, %v1266_v12  ;;  %v849_v45 = vrot.slane %v818_v54, %v88_v15  ;;  %v822_v46 = vrot.slane %v818_v54, %v94_v18 }
 0x604   :  { %v842_v33 = vmul.f32 %v961_v1, %v841_v31  ;;  %v827_v34 = vmul.f32 %v961_v1, %v826_v30 }
 0x606   :  { %v843_v36 = vsel %vm828_vm5, %v842_v33, 0.0  ;;  %v829_v38 = vsel %vm828_vm5, %v827_v34, 0.0 }
 0x607   :  { %844 = vadd.xlane.f32.xlu1 %v843_v36  ;;  %830 = vadd.xlane.f32.xlu0 %v829_v38 }
 0x694   :  { %v845_v47 = vpop.xlane.xlu1 %844  ;;  %v831_v48 = vpop.xlane.xlu0 %830 }
 0x695   :  { %v836_v49 = vmul.f32 %v835_v55, %v831_v48  ;;  %v850_v50 = vmul.f32 %v849_v45, %v845_v47 }
 0x697   :  { %v837_v51 = vadd.f32 %v836_v49, %v822_v46 }
 0x699   :  { %v851_v53 = vadd.f32 %v850_v50, %v837_v51 }
 0x69b   :  { %v852_v56 = vmax.f32 %v851_v53, 0.0 }
 0x69d   :  { %1012 = vmatmul.mubr.f32.vlgmr.msra.gmra.mrb[0].mxu0 %v852_v56 }
 0x770   :  { %v940_v61 = vpop.f32.mrb[0].mxu0 }
 0x771   :  { %v941_v62 = vadd.f32 %v940_v61, %v873_v60  ;;  %v1013_v52 = vpop.f32.mrb[1].mxu0 }
 0x773   :  { %944 = vst [vmem:[#allocation7] sm:$0xff] %v941_v62 }
 0x774   :  { %1183 = shalt.err (!%p1180_p6)
}
 0x775   :  { %s1184_s13 = scalar_lea.hbm %s1512_s2, 128 }
 0x776   :  { %p1185_p7 = scmp.ne.s32.totalorder %s1512_s2, %s1184_s13  ;;  %p1188_p8 = scmp.lt.u32.totalorder %s1184_s13, %s1512_s2 }
 0x778   :  { %p1190_p9 = pnand %p1188_p8, %p1185_p7 }
 0x77a   :  { %1193 = shalt.err (!%p1190_p9)
}
 0x77b   :  { %954 = dma.vmem_to_hbm [thread:$0]  %s952_s9, 128, %s1512_s2, [#allocation4]  }
 0x77c   :  { %1198 = dma.done.wait [#allocation4], 128  }
 0x77d   :  { %1199 = vsyncadd [#allocation4], 4294967168 }
 0x77e   :  { %958 = vsyncpa [#allocation3], 1 }
 0x77f   :  { %959 = vsyncpa [#allocation6], 1 }
 0x780   :  { %960 = vsyncpa [#allocation4], 1 }

</bundles_post_ra>
